<compile_context>
chip_gen: v6e
topology: v6e:2x2x1
jax: 0.10.0
libtpu: 0.0.40
codegen_flags: <defaults>
</compile_context>

<pallas_src>
import jax
import jax.numpy as jnp
from jax.experimental import pallas as pl
from jax.experimental.pallas import tpu as pltpu

THRESHOLD = 1.0  # snn_threshold


# --------------------------------------------------------------------------
# Pallas kernel: one batch element per grid step.
# --------------------------------------------------------------------------
def snn_inception_kernel(
    x_ref, wc1_ref, bc1_ref,
    p2_1_ref, w1_ref, b1_ref,
    p2_2_ref, w2_ref, b2_ref,
    wf1_ref, bf1_ref, wf2_ref, bf2_ref,
    out_ref,
    pad1_ref, pad2_ref,
):
    f32 = jnp.float32

    def spike(u):
        # snn.Leaky(beta=0.5, init_hidden=True), single step, zero init mem
        # reduces to a Heaviside on the pre-activation.
        return (u > THRESHOLD).astype(f32)

    def mm(a, b):
        return jnp.dot(a, b, preferred_element_type=f32)

    def inception(pad_ref, L, w_ref, b_ref, p2_ref):
        # pad_ref : (L + 4, Cin) zero-padded activation (interior pre-written)
        # w_ref   : (5, Cin, 4*Cout) packed tap weights [1x1 | 3x3 | 5x5 | pool]
        # b_ref   : (1, 4*Cout) packed biases
        # p2_ref  : (L//2, L) avgpool2 (stride 2) matrix
        y = mm(pad_ref[0:L, :], w_ref[0])          # tap offset -2
        for t in range(1, 5):                      # offsets -1, 0, +1, +2
            y = y + mm(pad_ref[t:t + L, :], w_ref[t])
        y = y + b_ref[...]
        z = mm(p2_ref[...], y)                     # AvgPool1d(2)
        return spike(z)                            # (L//2, 4*Cout)

    x = x_ref[0]                                   # (L0, Cin)
    L0 = x.shape[0]
    L1 = L0 // 2

    # conv1 (1x1) + Leaky
    s0 = spike(mm(x, wc1_ref[...]) + bc1_ref[...])  # (L0, 32)

    # stage into zero-padded scratch so conv taps are contiguous row slices
    pad1_ref[...] = jnp.zeros_like(pad1_ref)
    pad1_ref[2:2 + L0, :] = s0

    # inception block 1: 32 -> 128 channels, L0 -> L0/2
    a1 = inception(pad1_ref, L0, w1_ref, b1_ref, p2_1_ref)   # (L1, 128)

    pad2_ref[...] = jnp.zeros_like(pad2_ref)
    pad2_ref[2:2 + L1, :] = a1

    # inception block 2: 128 -> 256 channels, L0/2 -> L0/4
    a2 = inception(pad2_ref, L1, w2_ref, b2_ref, p2_2_ref)   # (L1//2, 256)

    # global mean over spatial (torch.mean(x, dim=2)); exact: spikes in {0,1}
    m = jnp.mean(a2, axis=0, keepdims=True)                  # (1, 256)

    h = spike(mm(m, wf1_ref[...]) + bf1_ref[...])            # (1, 64)
    o = spike(mm(h, wf2_ref[...]) + bf2_ref[...])            # (1, nc)
    out_ref[...] = o.reshape(1, 1, -1)


# --------------------------------------------------------------------------
# Wrapper: weight packing + pallas_call plumbing.
# --------------------------------------------------------------------------
def avgpool2_matrix(L):
    p = jnp.arange(L // 2)[:, None]
    l = jnp.arange(L)[None, :]
    return ((l == 2 * p) | (l == 2 * p + 1)).astype(jnp.float32) * 0.5


def pack_block_weights(p, pref, cin, cout):
    """Pack the 4 branch convs into 5 lane-dense (cin, 4*cout) tap weights."""
    w = jnp.zeros((5, cin, 4 * cout), jnp.float32)
    # tap index t corresponds to spatial offset (t - 2)
    w = w.at[2, :, 0:cout].set(p[pref + 'w1x1'])               # 1x1: offset 0
    w = w.at[1:4, :, cout:2 * cout].set(p[pref + 'w3'])        # k=3: -1..+1
    w = w.at[:, :, 2 * cout:3 * cout].set(p[pref + 'w5'])      # k=5: -2..+2
    wp3 = jnp.broadcast_to(p[pref + 'wp'][None] / 3.0, (3, cin, cout))
    w = w.at[1:4, :, 3 * cout:4 * cout].set(wp3)               # pool: avgpool3 folded
    b = jnp.concatenate([p[pref + 'b1x1'], p[pref + 'b3'],
                         p[pref + 'b5'], p[pref + 'bp']]).reshape(1, -1)
    return w, b


def run_pallas(x_ncl, p):
    B, cin, L0 = x_ncl.shape
    L1 = L0 // 2
    nc = p['wf2'].shape[1]
    x = jnp.transpose(x_ncl, (0, 2, 1)).astype(jnp.float32)    # (B, L0, Cin)

    w1, b1 = pack_block_weights(p, 'b1_', 32, 32)      # (5, 32, 128), (1, 128)
    w2, b2 = pack_block_weights(p, 'b2_', 128, 64)     # (5, 128, 256), (1, 256)
    p2_1 = avgpool2_matrix(L0)                         # (L0/2, L0)  -- tiny
    p2_2 = avgpool2_matrix(L1)                         # (L1/2, L1)  -- tiny

    r = lambda v: v.reshape(1, -1)
    weights = [p['wc1'], r(p['bc1']), p2_1, w1, b1, p2_2, w2, b2,
               p['wf1'], r(p['bf1']), p['wf2'], r(p['bf2'])]

    def full_spec(a):
        zeros = (0,) * a.ndim
        return pl.BlockSpec(a.shape, lambda b, _z=zeros: _z)

    flops = B * (2 * L0 * cin * 32
                 + 5 * 2 * L0 * 32 * 128 + 2 * L1 * L0 * 128
                 + 5 * 2 * L1 * 128 * 256 + 2 * (L1 // 2) * L1 * 256
                 + 2 * 256 * 64 + 2 * 64 * nc)
    bytes_accessed = 4 * (x.size + sum(int(w.size) for w in weights) + B * nc)

    # NOTE: total VMEM footprint here is far below the scoped default, so no
    # vmem_limit_bytes override is needed; for large L0 tile the spatial dim.
    out = pl.pallas_call(
        snn_inception_kernel,
        out_shape=jax.ShapeDtypeStruct((B, 1, nc), jnp.float32),
        grid=(B,),
        in_specs=[pl.BlockSpec((1, L0, cin), lambda b: (b, 0, 0))]
                 + [full_spec(w) for w in weights],
        out_specs=pl.BlockSpec((1, 1, nc), lambda b: (b, 0, 0)),
        scratch_shapes=[pltpu.VMEM((L0 + 4, 32), jnp.float32),
                        pltpu.VMEM((L1 + 4, 128), jnp.float32)],
        compiler_params=pltpu.CompilerParams(
            dimension_semantics=("parallel",)),
        cost_estimate=pl.CostEstimate(flops=int(flops), transcendentals=0,
                                      bytes_accessed=int(bytes_accessed)),
    )(x, *weights)
    return out[:, 0, :]


# --------------------------------------------------------------------------
# Pure-JAX reference (PyTorch NCL layout) for verification.
# --------------------------------------------------------------------------
def reference_forward(x_ncl, p):
    spk = lambda u: (u > THRESHOLD).astype(jnp.float32)

    def conv1d(x, w, bias, pad):
        # x: (B, Cin, L); w: (k, Cin, Cout); bias: (Cout,)
        B, Cin, L = x.shape
        k = w.shape[0]
        xp = jnp.pad(x, ((0, 0), (0, 0), (pad, pad)))
        y = jnp.zeros((B, w.shape[2], L), jnp.float32)
        for t in range(k):
            y = y + jnp.einsum('bcl,co->bol', xp[:, :, t:t + L], w[t])
        return y + bias[None, :, None]

    def avgpool2(x):
        B, C, L = x.shape
        return x.reshape(B, C, L // 2, 2).mean(axis=-1)

    def avgpool3_same(x):
        B, C, L = x.shape
        xp = jnp.pad(x, ((0, 0), (0, 0), (1, 1)))
        return (xp[:, :, 0:L] + xp[:, :, 1:L + 1] + xp[:, :, 2:L + 2]) / 3.0

    def block(x, pref):
        b1 = spk(avgpool2(conv1d(x, p[pref + 'w1x1'][None], p[pref + 'b1x1'], 0)))
        b3 = spk(avgpool2(conv1d(x, p[pref + 'w3'], p[pref + 'b3'], 1)))
        b5 = spk(avgpool2(conv1d(x, p[pref + 'w5'], p[pref + 'b5'], 2)))
        bp = spk(avgpool2(conv1d(avgpool3_same(x), p[pref + 'wp'][None],
                                 p[pref + 'bp'], 0)))
        return jnp.concatenate([b1, b3, b5, bp], axis=1)

    s0 = spk(conv1d(x_ncl, p['wc1'][None], p['bc1'], 0))
    s1 = block(s0, 'b1_')
    s2 = block(s1, 'b2_')
    m = jnp.mean(s2, axis=2)                       # (B, 256)
    h = spk(m @ p['wf1'] + p['bf1'][None, :])
    return spk(h @ p['wf2'] + p['bf2'][None, :])


# --------------------------------------------------------------------------
# Deterministic synthetic parameters (shapes from the module __init__).
# --------------------------------------------------------------------------
def make_params(key, cin, nc):
    keys = iter(jax.random.split(key, 64))

    def w(shape, fan_in):
        return (1.5 / float(fan_in) ** 0.5) * jax.random.normal(
            next(keys), shape, jnp.float32)

    def b(shape):
        return 0.1 * jax.random.normal(next(keys), shape, jnp.float32)

    p = {'wc1': w((cin, 32), cin), 'bc1': b((32,))}
    for name, ci, co in (('b1_', 32, 32), ('b2_', 128, 64)):
        p[name + 'w1x1'] = w((ci, co), ci);        p[name + 'b1x1'] = b((co,))
        p[name + 'w3'] = w((3, ci, co), 3 * ci);   p[name + 'b3'] = b((co,))
        p[name + 'w5'] = w((5, ci, co), 5 * ci);   p[name + 'b5'] = b((co,))
        p[name + 'wp'] = w((ci, co), ci);          p[name + 'bp'] = b((co,))
    p['wf1'] = w((256, 64), 256); p['bf1'] = b((64,))
    p['wf2'] = w((64, nc), 64);   p['bf2'] = b((nc,))
    return p


if __name__ == "__main__":
    B, CIN, L0, NC = 2, 4, 16, 8
    key = jax.random.PRNGKey(0)
    kx, kp = jax.random.split(key)
    x = jax.random.normal(kx, (B, CIN, L0), jnp.float32)  # PyTorch NCL input
    params = make_params(kp, CIN, NC)

    out = jax.block_until_ready(run_pallas(x, params))
    ref = reference_forward(x, params)

    assert out.shape == (B, NC)
    if not bool(jnp.all(out == ref)):
        raise AssertionError("Pallas kernel output mismatch vs JAX reference")
    print("KERNEL_OK")
</pallas_src>

<mosaic_0001>
module attributes {stable_mosaic.version = 11 : i64} {
  func.func @snn_inception_kernel(%arg0: i32, %arg1: memref<1x16x4xf32, #tpu.memory_space<vmem>>, %arg2: memref<4x32xf32, #tpu.memory_space<vmem>>, %arg3: memref<1x32xf32, #tpu.memory_space<vmem>>, %arg4: memref<8x16xf32, #tpu.memory_space<vmem>>, %arg5: memref<5x32x128xf32, #tpu.memory_space<vmem>>, %arg6: memref<1x128xf32, #tpu.memory_space<vmem>>, %arg7: memref<4x8xf32, #tpu.memory_space<vmem>>, %arg8: memref<5x128x256xf32, #tpu.memory_space<vmem>>, %arg9: memref<1x256xf32, #tpu.memory_space<vmem>>, %arg10: memref<256x64xf32, #tpu.memory_space<vmem>>, %arg11: memref<1x64xf32, #tpu.memory_space<vmem>>, %arg12: memref<64x8xf32, #tpu.memory_space<vmem>>, %arg13: memref<1x8xf32, #tpu.memory_space<vmem>>, %arg14: memref<1x1x8xf32, #tpu.memory_space<vmem>>, %arg15: memref<20x32xf32, #tpu.memory_space<vmem>>, %arg16: memref<12x128xf32, #tpu.memory_space<vmem>>) attributes {dimension_semantics = [#tpu.dimension_semantics<parallel>], iteration_bounds = array<i64: 2>, scalar_prefetch = 0 : i64, scratch_operands = 2 : i64, tpu.core_type = #tpu.core_type<tc>, window_params = [{transform_indices = @transform_0, window_bounds = array<i64: 1, 16, 4>}, {pipeline_mode = #tpu.pipeline_mode<synchronous>, transform_indices = @transform_1, window_bounds = array<i64: 4, 32>}, {pipeline_mode = #tpu.pipeline_mode<synchronous>, transform_indices = @transform_2, window_bounds = array<i64: 1, 32>}, {pipeline_mode = #tpu.pipeline_mode<synchronous>, transform_indices = @transform_3, window_bounds = array<i64: 8, 16>}, {pipeline_mode = #tpu.pipeline_mode<synchronous>, transform_indices = @transform_4, window_bounds = array<i64: 5, 32, 128>}, {pipeline_mode = #tpu.pipeline_mode<synchronous>, transform_indices = @transform_5, window_bounds = array<i64: 1, 128>}, {pipeline_mode = #tpu.pipeline_mode<synchronous>, transform_indices = @transform_6, window_bounds = array<i64: 4, 8>}, {pipeline_mode = #tpu.pipeline_mode<synchronous>, transform_indices = @transform_7, window_bounds = array<i64: 5, 128, 256>}, {pipeline_mode = #tpu.pipeline_mode<synchronous>, transform_indices = @transform_8, window_bounds = array<i64: 1, 256>}, {pipeline_mode = #tpu.pipeline_mode<synchronous>, transform_indices = @transform_9, window_bounds = array<i64: 256, 64>}, {pipeline_mode = #tpu.pipeline_mode<synchronous>, transform_indices = @transform_10, window_bounds = array<i64: 1, 64>}, {pipeline_mode = #tpu.pipeline_mode<synchronous>, transform_indices = @transform_11, window_bounds = array<i64: 64, 8>}, {pipeline_mode = #tpu.pipeline_mode<synchronous>, transform_indices = @transform_12, window_bounds = array<i64: 1, 8>}, {transform_indices = @transform_13, window_bounds = array<i64: 1, 1, 8>}]} {
    %c0 = arith.constant 0 : index
    %c0_0 = arith.constant 0 : index
    %c0_1 = arith.constant 0 : index
    %0 = vector.load %arg1[%c0, %c0_0, %c0_1] : memref<1x16x4xf32, #tpu.memory_space<vmem>>, vector<1x16x4xf32>
    %1 = vector.shape_cast %0 : vector<1x16x4xf32> to vector<16x4xf32>
    %c0_2 = arith.constant 0 : index
    %c0_3 = arith.constant 0 : index
    %2 = vector.load %arg2[%c0_2, %c0_3] : memref<4x32xf32, #tpu.memory_space<vmem>>, vector<4x32xf32>
    %cst = arith.constant dense<0.000000e+00> : vector<16x32xf32>
    %3 = tpu.matmul %1, %2, %cst {dimension_numbers = #tpu.dot_dimension_numbers<[1], [0], [0], [1], [0, 0, 1, 1], [], []>} : vector<16x4xf32>, vector<4x32xf32>, vector<16x32xf32> -> vector<16x32xf32>
    %c0_4 = arith.constant 0 : index
    %c0_5 = arith.constant 0 : index
    %4 = vector.load %arg3[%c0_4, %c0_5] : memref<1x32xf32, #tpu.memory_space<vmem>>, vector<1x32xf32>
    %5 = vector.broadcast %4 : vector<1x32xf32> to vector<16x32xf32>
    %6 = arith.addf %3, %5 : vector<16x32xf32>
    %cst_6 = arith.constant 1.000000e+00 : f32
    %7 = vector.broadcast %cst_6 : f32 to vector<16x32xf32>
    %8 = arith.cmpf ogt, %6, %7 : vector<16x32xf32>
    %9 = arith.extui %8 : vector<16x32xi1> to vector<16x32xi32>
    %10 = arith.sitofp %9 : vector<16x32xi32> to vector<16x32xf32>
    %cst_7 = arith.constant 0.000000e+00 : f32
    %11 = vector.broadcast %cst_7 : f32 to vector<20x32xf32>
    %c0_8 = arith.constant 0 : index
    %c0_9 = arith.constant 0 : index
    %12 = vector.load %arg15[%c0_8, %c0_9] : memref<20x32xf32, #tpu.memory_space<vmem>>, vector<20x32xf32>
    tpu.vector_store %arg15[%c0_8, %c0_9], %11 {strides = array<i32>} : memref<20x32xf32, #tpu.memory_space<vmem>>, vector<20x32xf32>,
    %c2 = arith.constant 2 : index
    %c0_10 = arith.constant 0 : index
    %13 = vector.load %arg15[%c2, %c0_10] : memref<20x32xf32, #tpu.memory_space<vmem>>, vector<16x32xf32>
    tpu.vector_store %arg15[%c2, %c0_10], %10 {strides = array<i32>} : memref<20x32xf32, #tpu.memory_space<vmem>>, vector<16x32xf32>,
    %c0_11 = arith.constant 0 : index
    %c0_12 = arith.constant 0 : index
    %14 = vector.load %arg15[%c0_11, %c0_12] : memref<20x32xf32, #tpu.memory_space<vmem>>, vector<16x32xf32>
    %c0_13 = arith.constant 0 : index
    %c0_14 = arith.constant 0 : index
    %c0_15 = arith.constant 0 : index
    %15 = vector.load %arg5[%c0_13, %c0_14, %c0_15] : memref<5x32x128xf32, #tpu.memory_space<vmem>>, vector<1x32x128xf32>
    %16 = vector.shape_cast %15 : vector<1x32x128xf32> to vector<32x128xf32>
    %cst_16 = arith.constant dense<0.000000e+00> : vector<16x128xf32>
    %17 = tpu.matmul %14, %16, %cst_16 {dimension_numbers = #tpu.dot_dimension_numbers<[1], [0], [0], [1], [0, 0, 1, 1], [], []>} : vector<16x32xf32>, vector<32x128xf32>, vector<16x128xf32> -> vector<16x128xf32>
    %c1 = arith.constant 1 : index
    %c0_17 = arith.constant 0 : index
    %18 = vector.load %arg15[%c1, %c0_17] : memref<20x32xf32, #tpu.memory_space<vmem>>, vector<16x32xf32>
    %c1_18 = arith.constant 1 : index
    %c0_19 = arith.constant 0 : index
    %c0_20 = arith.constant 0 : index
    %19 = vector.load %arg5[%c1_18, %c0_19, %c0_20] : memref<5x32x128xf32, #tpu.memory_space<vmem>>, vector<1x32x128xf32>
    %20 = vector.shape_cast %19 : vector<1x32x128xf32> to vector<32x128xf32>
    %cst_21 = arith.constant dense<0.000000e+00> : vector<16x128xf32>
    %21 = tpu.matmul %18, %20, %cst_21 {dimension_numbers = #tpu.dot_dimension_numbers<[1], [0], [0], [1], [0, 0, 1, 1], [], []>} : vector<16x32xf32>, vector<32x128xf32>, vector<16x128xf32> -> vector<16x128xf32>
    %22 = arith.addf %17, %21 : vector<16x128xf32>
    %c2_22 = arith.constant 2 : index
    %c0_23 = arith.constant 0 : index
    %23 = vector.load %arg15[%c2_22, %c0_23] : memref<20x32xf32, #tpu.memory_space<vmem>>, vector<16x32xf32>
    %c2_24 = arith.constant 2 : index
    %c0_25 = arith.constant 0 : index
    %c0_26 = arith.constant 0 : index
    %24 = vector.load %arg5[%c2_24, %c0_25, %c0_26] : memref<5x32x128xf32, #tpu.memory_space<vmem>>, vector<1x32x128xf32>
    %25 = vector.shape_cast %24 : vector<1x32x128xf32> to vector<32x128xf32>
    %cst_27 = arith.constant dense<0.000000e+00> : vector<16x128xf32>
    %26 = tpu.matmul %23, %25, %cst_27 {dimension_numbers = #tpu.dot_dimension_numbers<[1], [0], [0], [1], [0, 0, 1, 1], [], []>} : vector<16x32xf32>, vector<32x128xf32>, vector<16x128xf32> -> vector<16x128xf32>
    %27 = arith.addf %22, %26 : vector<16x128xf32>
    %c3 = arith.constant 3 : index
    %c0_28 = arith.constant 0 : index
    %28 = vector.load %arg15[%c3, %c0_28] : memref<20x32xf32, #tpu.memory_space<vmem>>, vector<16x32xf32>
    %c3_29 = arith.constant 3 : index
    %c0_30 = arith.constant 0 : index
    %c0_31 = arith.constant 0 : index
    %29 = vector.load %arg5[%c3_29, %c0_30, %c0_31] : memref<5x32x128xf32, #tpu.memory_space<vmem>>, vector<1x32x128xf32>
    %30 = vector.shape_cast %29 : vector<1x32x128xf32> to vector<32x128xf32>
    %cst_32 = arith.constant dense<0.000000e+00> : vector<16x128xf32>
    %31 = tpu.matmul %28, %30, %cst_32 {dimension_numbers = #tpu.dot_dimension_numbers<[1], [0], [0], [1], [0, 0, 1, 1], [], []>} : vector<16x32xf32>, vector<32x128xf32>, vector<16x128xf32> -> vector<16x128xf32>
    %32 = arith.addf %27, %31 : vector<16x128xf32>
    %c4 = arith.constant 4 : index
    %c0_33 = arith.constant 0 : index
    %33 = vector.load %arg15[%c4, %c0_33] : memref<20x32xf32, #tpu.memory_space<vmem>>, vector<16x32xf32>
    %c4_34 = arith.constant 4 : index
    %c0_35 = arith.constant 0 : index
    %c0_36 = arith.constant 0 : index
    %34 = vector.load %arg5[%c4_34, %c0_35, %c0_36] : memref<5x32x128xf32, #tpu.memory_space<vmem>>, vector<1x32x128xf32>
    %35 = vector.shape_cast %34 : vector<1x32x128xf32> to vector<32x128xf32>
    %cst_37 = arith.constant dense<0.000000e+00> : vector<16x128xf32>
    %36 = tpu.matmul %33, %35, %cst_37 {dimension_numbers = #tpu.dot_dimension_numbers<[1], [0], [0], [1], [0, 0, 1, 1], [], []>} : vector<16x32xf32>, vector<32x128xf32>, vector<16x128xf32> -> vector<16x128xf32>
    %37 = arith.addf %32, %36 : vector<16x128xf32>
    %c0_38 = arith.constant 0 : index
    %c0_39 = arith.constant 0 : index
    %38 = vector.load %arg6[%c0_38, %c0_39] : memref<1x128xf32, #tpu.memory_space<vmem>>, vector<1x128xf32>
    %39 = vector.broadcast %38 : vector<1x128xf32> to vector<16x128xf32>
    %40 = arith.addf %37, %39 : vector<16x128xf32>
    %c0_40 = arith.constant 0 : index
    %c0_41 = arith.constant 0 : index
    %41 = vector.load %arg4[%c0_40, %c0_41] : memref<8x16xf32, #tpu.memory_space<vmem>>, vector<8x16xf32>
    %cst_42 = arith.constant dense<0.000000e+00> : vector<8x128xf32>
    %42 = tpu.matmul %41, %40, %cst_42 {dimension_numbers = #tpu.dot_dimension_numbers<[1], [0], [0], [1], [0, 0, 1, 1], [], []>} : vector<8x16xf32>, vector<16x128xf32>, vector<8x128xf32> -> vector<8x128xf32>
    %cst_43 = arith.constant 1.000000e+00 : f32
    %43 = vector.broadcast %cst_43 : f32 to vector<8x128xf32>
    %44 = arith.cmpf ogt, %42, %43 : vector<8x128xf32>
    %45 = arith.extui %44 : vector<8x128xi1> to vector<8x128xi32>
    %46 = arith.sitofp %45 : vector<8x128xi32> to vector<8x128xf32>
    %cst_44 = arith.constant 0.000000e+00 : f32
    %47 = vector.broadcast %cst_44 : f32 to vector<12x128xf32>
    %c0_45 = arith.constant 0 : index
    %c0_46 = arith.constant 0 : index
    %48 = vector.load %arg16[%c0_45, %c0_46] : memref<12x128xf32, #tpu.memory_space<vmem>>, vector<12x128xf32>
    tpu.vector_store %arg16[%c0_45, %c0_46], %47 {strides = array<i32>} : memref<12x128xf32, #tpu.memory_space<vmem>>, vector<12x128xf32>,
    %c2_47 = arith.constant 2 : index
    %c0_48 = arith.constant 0 : index
    %49 = vector.load %arg16[%c2_47, %c0_48] : memref<12x128xf32, #tpu.memory_space<vmem>>, vector<8x128xf32>
    tpu.vector_store %arg16[%c2_47, %c0_48], %46 {strides = array<i32>} : memref<12x128xf32, #tpu.memory_space<vmem>>, vector<8x128xf32>,
    %c0_49 = arith.constant 0 : index
    %c0_50 = arith.constant 0 : index
    %50 = vector.load %arg16[%c0_49, %c0_50] : memref<12x128xf32, #tpu.memory_space<vmem>>, vector<8x128xf32>
    %c0_51 = arith.constant 0 : index
    %c0_52 = arith.constant 0 : index
    %c0_53 = arith.constant 0 : index
    %51 = vector.load %arg8[%c0_51, %c0_52, %c0_53] : memref<5x128x256xf32, #tpu.memory_space<vmem>>, vector<1x128x256xf32>
    %52 = vector.shape_cast %51 : vector<1x128x256xf32> to vector<128x256xf32>
    %cst_54 = arith.constant dense<0.000000e+00> : vector<8x256xf32>
    %53 = tpu.matmul %50, %52, %cst_54 {dimension_numbers = #tpu.dot_dimension_numbers<[1], [0], [0], [1], [0, 0, 1, 1], [], []>} : vector<8x128xf32>, vector<128x256xf32>, vector<8x256xf32> -> vector<8x256xf32>
    %c1_55 = arith.constant 1 : index
    %c0_56 = arith.constant 0 : index
    %54 = vector.load %arg16[%c1_55, %c0_56] : memref<12x128xf32, #tpu.memory_space<vmem>>, vector<8x128xf32>
    %c1_57 = arith.constant 1 : index
    %c0_58 = arith.constant 0 : index
    %c0_59 = arith.constant 0 : index
    %55 = vector.load %arg8[%c1_57, %c0_58, %c0_59] : memref<5x128x256xf32, #tpu.memory_space<vmem>>, vector<1x128x256xf32>
    %56 = vector.shape_cast %55 : vector<1x128x256xf32> to vector<128x256xf32>
    %cst_60 = arith.constant dense<0.000000e+00> : vector<8x256xf32>
    %57 = tpu.matmul %54, %56, %cst_60 {dimension_numbers = #tpu.dot_dimension_numbers<[1], [0], [0], [1], [0, 0, 1, 1], [], []>} : vector<8x128xf32>, vector<128x256xf32>, vector<8x256xf32> -> vector<8x256xf32>
    %58 = arith.addf %53, %57 : vector<8x256xf32>
    %c2_61 = arith.constant 2 : index
    %c0_62 = arith.constant 0 : index
    %59 = vector.load %arg16[%c2_61, %c0_62] : memref<12x128xf32, #tpu.memory_space<vmem>>, vector<8x128xf32>
    %c2_63 = arith.constant 2 : index
    %c0_64 = arith.constant 0 : index
    %c0_65 = arith.constant 0 : index
    %60 = vector.load %arg8[%c2_63, %c0_64, %c0_65] : memref<5x128x256xf32, #tpu.memory_space<vmem>>, vector<1x128x256xf32>
    %61 = vector.shape_cast %60 : vector<1x128x256xf32> to vector<128x256xf32>
    %cst_66 = arith.constant dense<0.000000e+00> : vector<8x256xf32>
    %62 = tpu.matmul %59, %61, %cst_66 {dimension_numbers = #tpu.dot_dimension_numbers<[1], [0], [0], [1], [0, 0, 1, 1], [], []>} : vector<8x128xf32>, vector<128x256xf32>, vector<8x256xf32> -> vector<8x256xf32>
    %63 = arith.addf %58, %62 : vector<8x256xf32>
    %c3_67 = arith.constant 3 : index
    %c0_68 = arith.constant 0 : index
    %64 = vector.load %arg16[%c3_67, %c0_68] : memref<12x128xf32, #tpu.memory_space<vmem>>, vector<8x128xf32>
    %c3_69 = arith.constant 3 : index
    %c0_70 = arith.constant 0 : index
    %c0_71 = arith.constant 0 : index
    %65 = vector.load %arg8[%c3_69, %c0_70, %c0_71] : memref<5x128x256xf32, #tpu.memory_space<vmem>>, vector<1x128x256xf32>
    %66 = vector.shape_cast %65 : vector<1x128x256xf32> to vector<128x256xf32>
    %cst_72 = arith.constant dense<0.000000e+00> : vector<8x256xf32>
    %67 = tpu.matmul %64, %66, %cst_72 {dimension_numbers = #tpu.dot_dimension_numbers<[1], [0], [0], [1], [0, 0, 1, 1], [], []>} : vector<8x128xf32>, vector<128x256xf32>, vector<8x256xf32> -> vector<8x256xf32>
    %68 = arith.addf %63, %67 : vector<8x256xf32>
    %c4_73 = arith.constant 4 : index
    %c0_74 = arith.constant 0 : index
    %69 = vector.load %arg16[%c4_73, %c0_74] : memref<12x128xf32, #tpu.memory_space<vmem>>, vector<8x128xf32>
    %c4_75 = arith.constant 4 : index
    %c0_76 = arith.constant 0 : index
    %c0_77 = arith.constant 0 : index
    %70 = vector.load %arg8[%c4_75, %c0_76, %c0_77] : memref<5x128x256xf32, #tpu.memory_space<vmem>>, vector<1x128x256xf32>
    %71 = vector.shape_cast %70 : vector<1x128x256xf32> to vector<128x256xf32>
    %cst_78 = arith.constant dense<0.000000e+00> : vector<8x256xf32>
    %72 = tpu.matmul %69, %71, %cst_78 {dimension_numbers = #tpu.dot_dimension_numbers<[1], [0], [0], [1], [0, 0, 1, 1], [], []>} : vector<8x128xf32>, vector<128x256xf32>, vector<8x256xf32> -> vector<8x256xf32>
    %73 = arith.addf %68, %72 : vector<8x256xf32>
    %c0_79 = arith.constant 0 : index
    %c0_80 = arith.constant 0 : index
    %74 = vector.load %arg9[%c0_79, %c0_80] : memref<1x256xf32, #tpu.memory_space<vmem>>, vector<1x256xf32>
    %75 = vector.broadcast %74 : vector<1x256xf32> to vector<8x256xf32>
    %76 = arith.addf %73, %75 : vector<8x256xf32>
    %c0_81 = arith.constant 0 : index
    %c0_82 = arith.constant 0 : index
    %77 = vector.load %arg7[%c0_81, %c0_82] : memref<4x8xf32, #tpu.memory_space<vmem>>, vector<4x8xf32>
    %cst_83 = arith.constant dense<0.000000e+00> : vector<4x256xf32>
    %78 = tpu.matmul %77, %76, %cst_83 {dimension_numbers = #tpu.dot_dimension_numbers<[1], [0], [0], [1], [0, 0, 1, 1], [], []>} : vector<4x8xf32>, vector<8x256xf32>, vector<4x256xf32> -> vector<4x256xf32>
    %cst_84 = arith.constant 1.000000e+00 : f32
    %79 = vector.broadcast %cst_84 : f32 to vector<4x256xf32>
    %80 = arith.cmpf ogt, %78, %79 : vector<4x256xf32>
    %81 = arith.extui %80 : vector<4x256xi1> to vector<4x256xi32>
    %82 = arith.sitofp %81 : vector<4x256xi32> to vector<4x256xf32>
    %cst_85 = arith.constant dense<0.000000e+00> : vector<256xf32>
    %83 = vector.multi_reduction <add>, %82, %cst_85 [0] : vector<4x256xf32> to vector<256xf32>
    %84 = vector.shape_cast %83 : vector<256xf32> to vector<1x256xf32>
    %cst_86 = arith.constant 4.000000e+00 : f32
    %85 = vector.broadcast %cst_86 : f32 to vector<1x256xf32>
    %86 = arith.divf %84, %85 : vector<1x256xf32>
    %c0_87 = arith.constant 0 : index
    %c0_88 = arith.constant 0 : index
    %87 = vector.load %arg10[%c0_87, %c0_88] : memref<256x64xf32, #tpu.memory_space<vmem>>, vector<256x64xf32>
    %cst_89 = arith.constant dense<0.000000e+00> : vector<1x64xf32>
    %88 = tpu.matmul %86, %87, %cst_89 {dimension_numbers = #tpu.dot_dimension_numbers<[1], [0], [0], [1], [0, 0, 1, 1], [], []>} : vector<1x256xf32>, vector<256x64xf32>, vector<1x64xf32> -> vector<1x64xf32>
    %c0_90 = arith.constant 0 : index
    %c0_91 = arith.constant 0 : index
    %89 = vector.load %arg11[%c0_90, %c0_91] : memref<1x64xf32, #tpu.memory_space<vmem>>, vector<1x64xf32>
    %90 = arith.addf %88, %89 : vector<1x64xf32>
    %cst_92 = arith.constant 1.000000e+00 : f32
    %91 = vector.broadcast %cst_92 : f32 to vector<1x64xf32>
    %92 = arith.cmpf ogt, %90, %91 : vector<1x64xf32>
    %93 = arith.extui %92 : vector<1x64xi1> to vector<1x64xi32>
    %94 = arith.sitofp %93 : vector<1x64xi32> to vector<1x64xf32>
    %c0_93 = arith.constant 0 : index
    %c0_94 = arith.constant 0 : index
    %95 = vector.load %arg12[%c0_93, %c0_94] : memref<64x8xf32, #tpu.memory_space<vmem>>, vector<64x8xf32>
    %cst_95 = arith.constant dense<0.000000e+00> : vector<1x8xf32>
    %96 = tpu.matmul %94, %95, %cst_95 {dimension_numbers = #tpu.dot_dimension_numbers<[1], [0], [0], [1], [0, 0, 1, 1], [], []>} : vector<1x64xf32>, vector<64x8xf32>, vector<1x8xf32> -> vector<1x8xf32>
    %c0_96 = arith.constant 0 : index
    %c0_97 = arith.constant 0 : index
    %97 = vector.load %arg13[%c0_96, %c0_97] : memref<1x8xf32, #tpu.memory_space<vmem>>, vector<1x8xf32>
    %98 = arith.addf %96, %97 : vector<1x8xf32>
    %cst_98 = arith.constant 1.000000e+00 : f32
    %99 = vector.broadcast %cst_98 : f32 to vector<1x8xf32>
    %100 = arith.cmpf ogt, %98, %99 : vector<1x8xf32>
    %101 = arith.extui %100 : vector<1x8xi1> to vector<1x8xi32>
    %102 = arith.sitofp %101 : vector<1x8xi32> to vector<1x8xf32>
    %103 = vector.shape_cast %102 : vector<1x8xf32> to vector<1x1x8xf32>
    %c0_99 = arith.constant 0 : index
    %c0_100 = arith.constant 0 : index
    %c0_101 = arith.constant 0 : index
    %104 = vector.load %arg14[%c0_99, %c0_100, %c0_101] : memref<1x1x8xf32, #tpu.memory_space<vmem>>, vector<1x1x8xf32>
    tpu.vector_store %arg14[%c0_99, %c0_100, %c0_101], %103 {strides = array<i32>} : memref<1x1x8xf32, #tpu.memory_space<vmem>>, vector<1x1x8xf32>,
    return
  }
  func.func @transform_0(%arg0: i32) -> (i32, i32, i32) {
    %c0_i32 = arith.constant 0 : i32
    %c0_i32_0 = arith.constant 0 : i32
    %c0_i32_1 = arith.constant 0 : i32
    return %arg0, %c0_i32, %c0_i32_0 : i32, i32, i32
  }
  func.func @transform_1(%arg0: i32) -> (i32, i32) {
    %c0_i32 = arith.constant 0 : i32
    %c0_i32_0 = arith.constant 0 : i32
    %c0_i32_1 = arith.constant 0 : i32
    return %c0_i32, %c0_i32_0 : i32, i32
  }
  func.func @transform_2(%arg0: i32) -> (i32, i32) {
    %c0_i32 = arith.constant 0 : i32
    %c0_i32_0 = arith.constant 0 : i32
    %c0_i32_1 = arith.constant 0 : i32
    return %c0_i32, %c0_i32_0 : i32, i32
  }
  func.func @transform_3(%arg0: i32) -> (i32, i32) {
    %c0_i32 = arith.constant 0 : i32
    %c0_i32_0 = arith.constant 0 : i32
    %c0_i32_1 = arith.constant 0 : i32
    return %c0_i32, %c0_i32_0 : i32, i32
  }
  func.func @transform_4(%arg0: i32) -> (i32, i32, i32) {
    %c0_i32 = arith.constant 0 : i32
    %c0_i32_0 = arith.constant 0 : i32
    %c0_i32_1 = arith.constant 0 : i32
    %c0_i32_2 = arith.constant 0 : i32
    return %c0_i32, %c0_i32_0, %c0_i32_1 : i32, i32, i32
  }
  func.func @transform_5(%arg0: i32) -> (i32, i32) {
    %c0_i32 = arith.constant 0 : i32
    %c0_i32_0 = arith.constant 0 : i32
    %c0_i32_1 = arith.constant 0 : i32
    return %c0_i32, %c0_i32_0 : i32, i32
  }
  func.func @transform_6(%arg0: i32) -> (i32, i32) {
    %c0_i32 = arith.constant 0 : i32
    %c0_i32_0 = arith.constant 0 : i32
    %c0_i32_1 = arith.constant 0 : i32
    return %c0_i32, %c0_i32_0 : i32, i32
  }
  func.func @transform_7(%arg0: i32) -> (i32, i32, i32) {
    %c0_i32 = arith.constant 0 : i32
    %c0_i32_0 = arith.constant 0 : i32
    %c0_i32_1 = arith.constant 0 : i32
    %c0_i32_2 = arith.constant 0 : i32
    return %c0_i32, %c0_i32_0, %c0_i32_1 : i32, i32, i32
  }
  func.func @transform_8(%arg0: i32) -> (i32, i32) {
    %c0_i32 = arith.constant 0 : i32
    %c0_i32_0 = arith.constant 0 : i32
    %c0_i32_1 = arith.constant 0 : i32
    return %c0_i32, %c0_i32_0 : i32, i32
  }
  func.func @transform_9(%arg0: i32) -> (i32, i32) {
    %c0_i32 = arith.constant 0 : i32
    %c0_i32_0 = arith.constant 0 : i32
    %c0_i32_1 = arith.constant 0 : i32
    return %c0_i32, %c0_i32_0 : i32, i32
  }
  func.func @transform_10(%arg0: i32) -> (i32, i32) {
    %c0_i32 = arith.constant 0 : i32
    %c0_i32_0 = arith.constant 0 : i32
    %c0_i32_1 = arith.constant 0 : i32
    return %c0_i32, %c0_i32_0 : i32, i32
  }
  func.func @transform_11(%arg0: i32) -> (i32, i32) {
    %c0_i32 = arith.constant 0 : i32
    %c0_i32_0 = arith.constant 0 : i32
    %c0_i32_1 = arith.constant 0 : i32
    return %c0_i32, %c0_i32_0 : i32, i32
  }
  func.func @transform_12(%arg0: i32) -> (i32, i32) {
    %c0_i32 = arith.constant 0 : i32
    %c0_i32_0 = arith.constant 0 : i32
    %c0_i32_1 = arith.constant 0 : i32
    return %c0_i32, %c0_i32_0 : i32, i32
  }
  func.func @transform_13(%arg0: i32) -> (i32, i32, i32) {
    %c0_i32 = arith.constant 0 : i32
    %c0_i32_0 = arith.constant 0 : i32
    %c0_i32_1 = arith.constant 0 : i32
    return %arg0, %c0_i32, %c0_i32_0 : i32, i32, i32
  }
}

</mosaic_0001>

<bundles_post_ra>
// kernel: tpu_custom_call.1
= control target key start
LH: loop header
LB: loop body
LE: loop exit
PB: predicated region body
PF: predicated region fallthrough
CT: control target
= control target key end

     0   :  { %s2829_s0 = inlined_call_operand.vmem [shape: f32[2,16,4], index: 0, kind: input, shape index: {}]   ;;  %s2830_s1 = inlined_call_operand.vmem [shape: f32[4,32], index: 1, kind: input, shape index: {}]   ;;  %s2831_s2 = inlined_call_operand.vmem [shape: f32[1,32], index: 2, kind: input, shape index: {}]   ;;  %s2832_s3 = inlined_call_operand.vmem [shape: f32[8,16], index: 3, kind: input, shape index: {}]   ;;  %s2833_s4 = inlined_call_operand.vmem [shape: f32[5,32,128], index: 4, kind: input, shape index: {}]   ;;  %s2834_s5 = inlined_call_operand.vmem [shape: f32[1,128], index: 5, kind: input, shape index: {}]   ;;  %s2835_s6 = inlined_call_operand.vmem [shape: f32[4,8], index: 6, kind: input, shape index: {}]   ;;  %s2836_s7 = inlined_call_operand.hbm [shape: f32[5,128,256], index: 7, kind: input, shape index: {}]   ;;  %s2837_s8 = inlined_call_operand.vmem [shape: f32[1,256], index: 8, kind: input, shape index: {}]   ;;  %s2838_s9 = inlined_call_operand.vmem [shape: f32[256,64], index: 9, kind: input, shape index: {}]   ;;  %s2839_s10 = inlined_call_operand.vmem [shape: f32[1,64], index: 10, kind: input, shape index: {}]   ;;  %s2840_s11 = inlined_call_operand.vmem [shape: f32[64,8], index: 11, kind: input, shape index: {}]   ;;  %s2841_s12 = inlined_call_operand.vmem [shape: f32[1,8], index: 12, kind: input, shape index: {}]   ;;  %s2842_s13 = inlined_call_operand.hbm [shape: f32[2,1,8], index: 13, kind: output, shape index: {}]  }
   0x1   :  { %2844 = sst [smem:[#allocation12_spill]] %s2829_s0 }
   0x2   :  { %18 = vsyncpa [#allocation5], 0 }
   0x3   :  { %19 = vsyncpa [#allocation6], 0 }
   0x4   :  { %21 = vsyncpa [#allocation6 + $0x1], 0  ;;  %s2457_s25 = smov 0   ;;  %s2459_s26 = smov 0  }
   0x5   :  { %s2461_s27 = smov 0   ;;  %s2463_s28 = smov 0  }
   0x6 LB: > { %2845 = sst [smem:[#allocation10_spill]] %s2374_s27  ;;  %s2478_s29 = sadd.s32 4294967295, %s2378_s28   ;;  %s2378_s28 = sphi %s2463_s28, %s2856_s28   ;;  %s2374_s27 = sphi %s2461_s27, %s2853_s27   ;;  %s2370_s26 = sphi %s2459_s26, %s2855_s26   ;;  %s2366_s25 = sphi %s2457_s25, %s2854_s25  }
   0x7   : > { %s2014_s30 = sadd.s32 4294967294, %s2378_s28   ;;  %s2482_s14 = sadd.s32 1, %s2378_s28  }
   0x8   : > { %s312_s15 = sadd.s32 1, %s2374_s27  ;;  %s309_s16 = ssub.s32 %s2378_s28, %s2482_s14 }
   0x9   : > { %p322_p0 = scmp.ne.s32.totalorder %s2374_s27, %s2370_s26  ;;  %p310_p1 = scmp.eq.s32.totalorder %s309_s16, 0 }
   0xa   : > { %p323_p2 = scmp.eq.s32.totalorder %s2478_s29, 1  ;;  %p328_p3 = scmp.ne.s32.totalorder %s2370_s26, %s2366_s25 }
   0xb   : > { %p329_p4 = scmp.eq.s32.totalorder %s2014_s30, 1  ;;  %p2015_p7 = scmp.ge.s32.totalorder %s2378_s28, 1 }
   0xc   : > { %s2493_s17 = scalar_select %p310_p1, %s2374_s27, %s312_s15  }
   0xd   : > { %p2495_p5 = por %p323_p2, %p322_p0  ;;  %p2499_p6 = por %p329_p4, %p328_p3 }
   0xe   : > { %2846 = sst [smem:[#allocation11_spill]] %s2493_s17  ;;  %p336_p8 = scmp.lt.s32.totalorder %s2378_s28, 3 }
   0xf   : > { %s2848_s19 = scalar_select %p2499_p6, 1, 0 }
  0x10   : > { %p2247_p9 = scmp.eq.s32.totalorder %s2478_s29, 0  ;;  %p2506_p10 = pnand %p2015_p7, %p336_p8 }
  0x11   : > { %s2380_s21 = smov [#allocation4]  }
  0x12   : > { %s366_s22 = sshll.u32 %s2380_s21, 4  ;;  %p2239_p11 = pneg %p2506_p10  ;;  %s367_s22 = int_to_ptr.vmem [resolvable:$true] %s366_s22 }
  0x13   : > { %s2299_s23 = scalar_lea.vmem %s367_s22, 20480  ;;  %p2307_p3 = scmp.lt.s32.totalorder %s367_s22, %s367_s22 }
  0x14   : > { %p2240_p12 = pnand %p2247_p9, %p2239_p11  ;;  %p2300_p0 = scmp.ne.s32.totalorder %s367_s22, %s2299_s23 }
  0x15   : > { %p2308_p4 = scmp.lt.s32.totalorder %s2299_s23, %s2299_s23 }
  0x16   : > { %p2290_p13 = pneg %p2240_p12 }
  0x17   : > { %p2309_p6 = por %p2308_p4, %p2307_p3 }
  0x18   : > { %p2302_p1 = pnand %p2300_p0, %p2290_p13 }
  0x1a   : > { %p2303_p2 = pneg %p2302_p1 }
  0x1c   : > { %p2310_p7 = pnand %p2309_p6, %p2303_p2 }
  0x1e   : > { %2313 = shalt.err (!%p2310_p7)
}
  0x1f   : > { %s2381_s24 = smov 256   ;;  %s2382_s30 = smov 16  }
  0x20   : > { %2242 = dma.hbm_to_vmem [thread:$0]  (!%p2240_p12), %s2836_s7, 20480, %s367_s22, [#allocation5], %s2381_s24, %s2381_s24, %s2382_s30  }
  0x21   : > { %405 = sbr.rel (%p2506_p10) target bundleno = 1568 (0x620), region = 72 }
  0x26   : > { %2357 = dma.done.wait (%p2247_p9), [#allocation5], 20480  }
  0x27   : > { %2359 = vsyncadd (%p2247_p9), [#allocation5], 4294946816  ;;  %p448_p8 = scmp.lt.s32.totalorder %s2478_s29, 1  ;;  %vm470_vm0 = vcmask 1043456   ;;  %s2850_s0 = sld [smem:[#allocation12_spill]]  ;;  %vm463_vm1 = vcmask 31744  }
  0x28   : > { %v455_v0 = vld [vmem:[%s2830_s1] sm:$0xf]  ;;  %vm555_vm2 = vcmask 261120   ;;  %vm558_vm3 = vcmask 257024   ;;  %v2383_v3 = vmov 0.0   ;;  %v2031_v4 = vld [vmem:[%s2833_s4 + $0x38] sm:$0xff] }
  0x29   : > { %s449_s21 = scalar_select %p448_p8, %s2478_s29, 1  ;;  %2147 = vmatprep.subr.msk.mxu0 %vm470_vm0, %v455_v0  ;;  %557 = vst.msk [vmem:[#allocation2 + $0x8] sm:$0xff] %vm555_vm2, %v2383_v3  ;;  %556 = vst.msk [vmem:[#allocation2] sm:$0xff] %vm555_vm2, %v2383_v3  ;;  %v567_v5 = vld [vmem:[%s2833_s4 + $0x18] sm:$0xff]  ;;  %2152 = vmatprep.subr.mxu1 %v2031_v4  ;;  %v2030_v6 = vld [vmem:[%s2833_s4 + $0x30] sm:$0xff]  ;;  %vm2384_vm6 = vmmov 0  }
  0x2a   : > { %2148 = vmatpush3.msk.msra.mxu0 %vm470_vm0, %v455_v0  ;;  %559 = vst.msk [vmem:[#allocation2 + $0x10] sm:$0xf] %vm558_vm3, %v2383_v3  ;;  %1094 = vst [vmem:[#allocation3] sm:$0xff] %v2383_v3  ;;  %v566_v7 = vld [vmem:[%s2833_s4 + $0x10] sm:$0xff]  ;;  %2153 = vmatpush3.msra.mxu1 %v2031_v4  ;;  %v2029_v8 = vld [vmem:[%s2833_s4 + $0x28] sm:$0xff]  ;;  %vm1017_vm7 = vcmask 130048  }
  0x2b   : > { %s2066_s23 = sshll.u32 %s449_s21, 4  ;;  %1095 = vst [vmem:[#allocation3 + $0x8] sm:$0xf] %v2383_v3  ;;  %2163 = vmatprep.subr.mxu0 %v567_v5  ;;  %v565_v9 = vld [vmem:[%s2833_s4 + $0x8] sm:$0xff]  ;;  %2154 = vmatprep.subr.mxu1 %v2030_v6  ;;  %v2028_v10 = vld [vmem:[%s2833_s4 + $0x20] sm:$0xff]  ;;  %v2039_v12 = vld [vmem:[%s2833_s4 + $0x58] sm:$0xff] }
  0x2c   : > { %2155 = vmatpush3.msra.mxu1 %v2030_v6  ;;  %v564_v11 = vld [vmem:[%s2833_s4] sm:$0xff]  ;;  %v2045_v13 = vld [vmem:[%s2833_s4 + $0x78] sm:$0xff]  ;;  %v2038_v25 = vld [vmem:[%s2833_s4 + $0x50] sm:$0xff]  ;;  %vm1642_vm9 = vcmask 64512   ;;  %vm1855_vm12 = vcmask 523264   ;;  %s446_s24 = sand.u32 1, %s2370_s26  }
  0x2d   : > { %s452_s15 = scalar_lea.vmem %s2850_s0, %s2066_s23  ;;  %2156 = vmatprep.subr.mxu1 %v2029_v8  ;;  %v2022_v14 = vld [vmem:[%s2831_s2] ss:$0 sm:$0xff]  ;;  %v2044_v26 = vld [vmem:[%s2833_s4 + $0x70] sm:$0xff]  ;;  %v2037_v29 = vld [vmem:[%s2833_s4 + $0x48] sm:$0xff]  ;;  %s2063_s21 = sshll.u32 %s2478_s29, 4  ;;  %vm1932_vm14 = vcmask 57344  }
  0x2e   : > { %v453_v1 = vld [vmem:[%s452_s15] sm:$0xff]  ;;  %v454_v2 = vld [vmem:[%s452_s15 + $0x8] sm:$0xff]  ;;  %2157 = vmatpush3.msra.mxu1 %v2029_v8  ;;  %v2051_v33 = vld [vmem:[%s2833_s4 + $0x98] sm:$0xff]  ;;  %s447_s23 = scalar_lea.vmem [#allocation7], %s446_s24  ;;  %s2793_s27 = scalar_lea.hbm %s2842_s13, %s2063_s21 }
  0x2f   : > { %2149 = vmatprep.mubr.msk.f32.mxu0 %vm463_vm1, %v453_v1  ;;  %2158 = vmatprep.subr.mxu1 %v2028_v10  ;;  %v2043_v30 = vld [vmem:[%s2833_s4 + $0x68] sm:$0xff]  ;;  %v2036_v31 = vld [vmem:[%s2833_s4 + $0x40] sm:$0xff]  ;;  %v2050_v37 = vld [vmem:[%s2833_s4 + $0x90] sm:$0xff]  ;;  %s1947_s15 = sshll.u32 %s447_s23, 4  ;;  %s1935_s17 = scalar_lea.sflag [#allocation6], %s446_s24  ;;  %s1948_s15 = int_to_ptr.vmem [resolvable:$true] %s1947_s15 }
  0x30   : > { %2150 = vmatmul.mubr.msk.f32.vlgmr.msra.gmra.mxu0 %vm463_vm1, %v454_v2  ;;  %2159 = vmatpush3.msra.mxu1 %v2028_v10  ;;  %v2042_v32 = vld [vmem:[%s2833_s4 + $0x60] sm:$0xff]  ;;  %v2049_v38 = vld [vmem:[%s2833_s4 + $0x88] sm:$0xff]  ;;  %v1162_v42 = vld [vmem:[#allocation4 + $0x1f0] sm:$0xff]  ;;  %s2314_s30 = scalar_lea.vmem %s1948_s15, 16  ;;  %s2386_s29 = smov [#allocation7]  }
  0x31   : > { %2164 = vmatpush3.msra.mxu0 %v567_v5  ;;  %2174 = vmatprep.subr.mxu1 %v2039_v12  ;;  %v2048_v39 = vld [vmem:[%s2833_s4 + $0x80] sm:$0xff]  ;;  %v1161_v43 = vld [vmem:[#allocation4 + $0x1e8] sm:$0xff]  ;;  %v1160_v44 = vld [vmem:[#allocation4 + $0x1e0] sm:$0xff]  ;;  %p2315_p6 = scmp.ne.s32.totalorder %s1948_s15, %s2314_s30  ;;  %s2318_s16 = sshll.u32 %s2386_s29, 4  ;;  %s2319_s16 = int_to_ptr.vmem [resolvable:$false] %s2318_s16 }
  0x32   : > { %2165 = vmatprep.subr.mxu0 %v566_v7  ;;  %v1163_v41 = vld [vmem:[#allocation4 + $0x1f8] sm:$0xff]  ;;  %v1158_v46 = vld [vmem:[#allocation4 + $0x1d0] sm:$0xff]  ;;  %v1157_v47 = vld [vmem:[#allocation4 + $0x1c8] sm:$0xff]  ;;  %s2320_s0 = scalar_lea.vmem %s2319_s16, 32  ;;  %p2321_p11 = scmp.lt.s32.totalorder %s1948_s15, %s2319_s16 }
  0x33   : > { %2166 = vmatpush3.msra.mxu0 %v566_v7  ;;  %v1159_v45 = vld [vmem:[#allocation4 + $0x1d8] sm:$0xff]  ;;  %v1156_v48 = vld [vmem:[#allocation4 + $0x1c0] sm:$0xff]  ;;  %v1154_v50 = vld [vmem:[#allocation4 + $0x1b0] sm:$0xff]  ;;  %p2316_p9 = pnand %p2315_p6, %p2495_p5  ;;  %p2322_p12 = scmp.lt.s32.totalorder %s2320_s0, %s2314_s30 }
  0x34   : > { %2167 = vmatprep.subr.mxu0 %v565_v9  ;;  %v1155_v49 = vld [vmem:[#allocation4 + $0x1b8] sm:$0xff]  ;;  %v1153_v51 = vld [vmem:[#allocation4 + $0x1a8] sm:$0xff]  ;;  %v1152_v52 = vld [vmem:[#allocation4 + $0x1a0] sm:$0xff] }
  0x35   : > { %2168 = vmatpush3.msra.mxu0 %v565_v9  ;;  %v1151_v53 = vld [vmem:[#allocation4 + $0x198] sm:$0xff]  ;;  %v1150_v54 = vld [vmem:[#allocation4 + $0x190] sm:$0xff]  ;;  %v1149_v55 = vld [vmem:[#allocation4 + $0x188] sm:$0xff]  ;;  %p2317_p10 = pneg %p2316_p9  ;;  %p2323_p13 = por %p2322_p12, %p2321_p11 }
  0x36   : > { %2169 = vmatprep.subr.mxu0 %v564_v11  ;;  %v1148_v56 = vld [vmem:[#allocation4 + $0x180] sm:$0xff]  ;;  %v1147_v57 = vld [vmem:[#allocation4 + $0x178] sm:$0xff]  ;;  %v1146_v58 = vld [vmem:[#allocation4 + $0x170] sm:$0xff] }
  0x37   : > { %2170 = vmatpush3.msra.mxu0 %v564_v11  ;;  %v1145_v59 = vld [vmem:[#allocation4 + $0x168] sm:$0xff]  ;;  %v1144_v60 = vld [vmem:[#allocation4 + $0x160] sm:$0xff]  ;;  %v1143_v61 = vld [vmem:[#allocation4 + $0x158] sm:$0xff]  ;;  %p2324_p0 = pnand %p2323_p13, %p2317_p10 }
  0x38   : > { %2185 = vmatprep.subr.mxu0 %v2045_v13  ;;  %v1142_v62 = vld [vmem:[#allocation4 + $0x150] sm:$0xff] }
  0xf0   : > { %v2151_v15 = vpop.f32.mrf.mxu0 }
  0xf1   : > { %v546_v16 = vadd.f32 %v2151_v15, %v2022_v14 }
  0xf2   : > { %v540_v17 = vpop.f32.mrf.mxu0 }
  0xf3   : > { %vm550_vm4 = vcmp.gt.f32.partialorder %v546_v16, 1.0  ;;  %v541_v18 = vadd.f32 %v2022_v14, %v540_v17  ;;  %v2054_v14 = vld [vmem:[%s2834_s5] ss:$0 sm:$0xff] }
  0xf4   : > { %v2027_v19 = vsel %vm550_vm4, 1.0, %v2383_v3 }
  0xf5   : > { %561 = vst.msk [vmem:[#allocation2 + $0xa] sm:$0xff] %vm555_vm2, %v2027_v19  ;;  %vm549_vm5 = vcmp.gt.f32.partialorder %v541_v18, 1.0 }
  0xf6   : > { %v2026_v20 = vsel %vm549_vm5, 1.0, %v2383_v3 }
  0xf7   : > { %560 = vst.msk [vmem:[#allocation2 + $0x2] sm:$0xff] %vm555_vm2, %v2026_v20 }
  0xfc   : > { %v738_v34 = vld [vmem:[#allocation2 + $0xa] sm:$0xff] }
  0xfd   : > { %v828_v35 = vld [vmem:[#allocation2 + $0xb] sm:$0xff] }
  0xfe   : > { %v568_v21 = vld [vmem:[#allocation2 + $0x1] sm:$0xff]  ;;  %v569_v23 = vld [vmem:[#allocation2 + $0x9] sm:$0xff] }
  0xff   : > { %v562_v22 = vld [vmem:[#allocation2] sm:$0xff]  ;;  %2160 = vmatprep.mubr.msk.f32.mxu1 %vm555_vm2, %v568_v21  ;;  %v563_v24 = vld [vmem:[#allocation2 + $0x8] sm:$0xff] }
 0x100   : > { %2171 = vmatprep.mubr.msk.f32.mxu0 %vm555_vm2, %v562_v22  ;;  %2161 = vmatmul.mubr.msk.f32.vlgmr.msra.gmra.mxu1 %vm555_vm2, %v569_v23  ;;  %v737_v27 = vld [vmem:[#allocation2 + $0x2] sm:$0xff]  ;;  %v918_v40 = vld [vmem:[#allocation2 + $0xc] sm:$0xff]  ;;  %v1128_v23 = vld [vmem:[#allocation4 + $0xf0] sm:$0xff] }
 0x101   : > { %2172 = vmatmul.mubr.msk.f32.vlgmr.msra.gmra.mxu0 %vm555_vm2, %v563_v24  ;;  %2175 = vmatpush3.msra.mxu1 %v2039_v12  ;;  %v827_v28 = vld [vmem:[#allocation2 + $0x3] sm:$0xff]  ;;  %v1127_v24 = vld [vmem:[#allocation4 + $0xe8] sm:$0xff] }
 0x102   : > { %2186 = vmatpush3.msra.mxu0 %v2045_v13  ;;  %2176 = vmatprep.subr.mxu1 %v2038_v25  ;;  %v917_v36 = vld [vmem:[#allocation2 + $0x4] sm:$0xff] }
 0x103   : > { %2182 = vmatprep.mubr.msk.f32.mxu1 %vm555_vm2, %v737_v27  ;;  %2187 = vmatprep.subr.mxu0 %v2044_v26  ;;  %v1016_v21 = vld [vmem:[%s2832_s3] sm:$0xff]  ;;  %v1124_v27 = vld [vmem:[#allocation4 + $0xd0] sm:$0xff] }
 0x104   : > { %2193 = vmatprep.mubr.msk.f32.mxu0 %vm555_vm2, %v827_v28  ;;  %2177 = vmatpush3.msra.mxu1 %v2038_v25  ;;  %v1129_v22 = vld [vmem:[#allocation4 + $0xf8] sm:$0xff]  ;;  %v1126_v25 = vld [vmem:[#allocation4 + $0xe0] sm:$0xff]  ;;  %v1123_v28 = vld [vmem:[#allocation4 + $0xc8] sm:$0xff] }
 0x105   : > { %2188 = vmatpush3.msra.mxu0 %v2044_v26  ;;  %2178 = vmatprep.subr.mxu1 %v2037_v29  ;;  %v1125_v26 = vld [vmem:[#allocation4 + $0xd8] sm:$0xff] }
 0x106   : > { %2189 = vmatprep.subr.mxu0 %v2043_v30  ;;  %2179 = vmatpush3.msra.mxu1 %v2037_v29  ;;  %v1122_v29 = vld [vmem:[#allocation4 + $0xc0] sm:$0xff] }
 0x107   : > { %2190 = vmatpush3.msra.mxu0 %v2043_v30  ;;  %2180 = vmatprep.subr.mxu1 %v2036_v31  ;;  %v1121_v30 = vld [vmem:[#allocation4 + $0xb8] sm:$0xff] }
 0x108   : > { %2191 = vmatprep.subr.mxu0 %v2042_v32  ;;  %2181 = vmatpush3.msra.mxu1 %v2036_v31  ;;  %v1120_v31 = vld [vmem:[#allocation4 + $0xb0] sm:$0xff] }
 0x109   : > { %2192 = vmatpush3.msra.mxu0 %v2042_v32  ;;  %2183 = vmatmul.mubr.msk.f32.vlgmr.msra.gmra.mxu1 %vm555_vm2, %v738_v34  ;;  %v1119_v32 = vld [vmem:[#allocation4 + $0xa8] sm:$0xff]  ;;  %v1117_v34 = vld [vmem:[#allocation4 + $0x98] sm:$0xff] }
 0x10a   : > { %2194 = vmatmul.mubr.msk.f32.vlgmr.msra.gmra.mxu0 %vm555_vm2, %v828_v35  ;;  %2196 = vmatprep.subr.mxu1 %v2051_v33  ;;  %v1116_v35 = vld [vmem:[#allocation4 + $0x90] sm:$0xff] }
 0x10b   : > { %2204 = vmatprep.mubr.msk.f32.mxu1 %vm555_vm2, %v917_v36  ;;  %2197 = vmatpush3.msra.mxu1 %v2051_v33  ;;  %v1118_v33 = vld [vmem:[#allocation4 + $0xa0] sm:$0xff]  ;;  %v1115_v36 = vld [vmem:[#allocation4 + $0x88] sm:$0xff] }
 0x10c   : > { %1228 = vmatprep.mubr.f32.mxu0 %v2383_v3  ;;  %2198 = vmatprep.subr.mxu1 %v2050_v37 }
 0x10d   : > { %2199 = vmatpush3.msra.mxu1 %v2050_v37  ;;  %1164 = vmatprep.subr.mxu0 %v1163_v41  ;;  %v1114_v37 = vld [vmem:[#allocation4 + $0x80] sm:$0xff] }
 0x10e   : > { %2200 = vmatprep.subr.mxu1 %v2049_v38  ;;  %1165 = vmatpush1.msra.mxu0 %v1162_v42  ;;  %v1110_v41 = vld [vmem:[#allocation4 + $0x60] sm:$0xff]  ;;  %v1109_v42 = vld [vmem:[#allocation4 + $0x58] sm:$0xff] }
 0x10f   : > { %2201 = vmatpush3.msra.mxu1 %v2049_v38  ;;  %1166 = vmatprep.subr.mxu0 %v1161_v43  ;;  %v1113_v38 = vld [vmem:[#allocation4 + $0x78] sm:$0xff]  ;;  %v1108_v43 = vld [vmem:[#allocation4 + $0x50] sm:$0xff] }
 0x110   : > { %2202 = vmatprep.subr.mxu1 %v2048_v39  ;;  %1167 = vmatpush1.msra.mxu0 %v1160_v44  ;;  %v1141_v44 = vld [vmem:[#allocation4 + $0x148] sm:$0xff] }
 0x111   : > { %2203 = vmatpush3.msra.mxu1 %v2048_v39  ;;  %1168 = vmatprep.subr.mxu0 %v1159_v45  ;;  %v1112_v39 = vld [vmem:[#allocation4 + $0x70] sm:$0xff]  ;;  %v1107_v45 = vld [vmem:[#allocation4 + $0x48] sm:$0xff] }
 0x112   : > { %2205 = vmatmul.mubr.msk.f32.vlgmr.msra.gmra.mxu1 %vm555_vm2, %v918_v40  ;;  %2207 = vmatprep.subr.mxu1 %v2383_v3  ;;  %v1111_v40 = vld [vmem:[#allocation4 + $0x68] sm:$0xff] }
 0x113   : > { %2211 = vmatprep.mubr.msk.f32.mxu1 %vm2384_vm6, %v2383_v3  ;;  %1169 = vmatpush1.msra.mxu0 %v1158_v46  ;;  %v1140_v46 = vld [vmem:[#allocation4 + $0x140] sm:$0xff] }
 0x114   : > { %1170 = vmatprep.subr.mxu0 %v1157_v47  ;;  %v1106_v47 = vld [vmem:[#allocation4 + $0x40] sm:$0xff] }
 0x115   : > { %1171 = vmatpush1.msra.mxu0 %v1156_v48  ;;  %v1139_v48 = vld [vmem:[#allocation4 + $0x138] sm:$0xff] }
 0x116   : > { %1172 = vmatprep.subr.mxu0 %v1155_v49  ;;  %v1105_v49 = vld [vmem:[#allocation4 + $0x38] sm:$0xff] }
 0x117   : > { %1173 = vmatpush1.msra.mxu0 %v1154_v50  ;;  %v1138_v50 = vld [vmem:[#allocation4 + $0x130] sm:$0xff] }
 0x118   : > { %1174 = vmatprep.subr.mxu0 %v1153_v51  ;;  %v1104_v51 = vld [vmem:[#allocation4 + $0x30] sm:$0xff] }
 0x119   : > { %1175 = vmatpush1.msra.mxu0 %v1152_v52  ;;  %v1137_v52 = vld [vmem:[#allocation4 + $0x128] sm:$0xff] }
 0x11a   : > { %1176 = vmatprep.subr.mxu0 %v1151_v53  ;;  %v1103_v53 = vld [vmem:[#allocation4 + $0x28] sm:$0xff] }
 0x11b   : > { %1177 = vmatpush1.msra.mxu0 %v1150_v54  ;;  %v1136_v54 = vld [vmem:[#allocation4 + $0x120] sm:$0xff] }
 0x11c   : > { %1178 = vmatprep.subr.mxu0 %v1149_v55  ;;  %v1102_v55 = vld [vmem:[#allocation4 + $0x20] sm:$0xff] }
 0x11d   : > { %1179 = vmatpush1.msra.mxu0 %v1148_v56  ;;  %v1135_v56 = vld [vmem:[#allocation4 + $0x118] sm:$0xff] }
 0x11e   : > { %1180 = vmatprep.subr.mxu0 %v1147_v57  ;;  %v1101_v57 = vld [vmem:[#allocation4 + $0x18] sm:$0xff] }
 0x11f   : > { %1181 = vmatpush1.msra.mxu0 %v1146_v58  ;;  %v1134_v58 = vld [vmem:[#allocation4 + $0x110] sm:$0xff] }
 0x120   : > { %1182 = vmatprep.subr.mxu0 %v1145_v59  ;;  %v1100_v59 = vld [vmem:[#allocation4 + $0x10] sm:$0xff] }
 0x121   : > { %1183 = vmatpush1.msra.mxu0 %v1144_v60  ;;  %v1133_v60 = vld [vmem:[#allocation4 + $0x108] sm:$0xff] }
 0x122   : > { %1184 = vmatprep.subr.mxu0 %v1143_v61  ;;  %v1099_v61 = vld [vmem:[#allocation4 + $0x8] sm:$0xff] }
 0x123   : > { %1185 = vmatpush1.msra.mxu0 %v1142_v62  ;;  %v1132_v62 = vld [vmem:[#allocation4 + $0x100] sm:$0xff] }
 0x124   : > { %1186 = vmatprep.subr.mxu0 %v1141_v44  ;;  %v1320_v44 = vld [vmem:[#allocation4 + $0x260] sm:$0xff] }
 0x125   : > { %1187 = vmatpush1.msra.mxu0 %v1140_v46  ;;  %v1319_v46 = vld [vmem:[#allocation4 + $0x258] sm:$0xff] }
 0x126   : > { %1188 = vmatprep.subr.mxu0 %v1139_v48  ;;  %v1318_v48 = vld [vmem:[#allocation4 + $0x250] sm:$0xff] }
 0x127   : > { %1189 = vmatpush1.msra.mxu0 %v1138_v50  ;;  %v1317_v50 = vld [vmem:[#allocation4 + $0x248] sm:$0xff] }
 0x128   : > { %1190 = vmatprep.subr.mxu0 %v1137_v52  ;;  %v1316_v52 = vld [vmem:[#allocation4 + $0x240] sm:$0xff] }
 0x129   : > { %1191 = vmatpush1.msra.mxu0 %v1136_v54  ;;  %v1315_v54 = vld [vmem:[#allocation4 + $0x238] sm:$0xff] }
 0x12a   : > { %1192 = vmatprep.subr.mxu0 %v1135_v56  ;;  %v1314_v56 = vld [vmem:[#allocation4 + $0x230] sm:$0xff] }
 0x12b   : > { %1193 = vmatpush1.msra.mxu0 %v1134_v58  ;;  %v1313_v58 = vld [vmem:[#allocation4 + $0x228] sm:$0xff] }
 0x12c   : > { %1194 = vmatprep.subr.mxu0 %v1133_v60  ;;  %v1312_v60 = vld [vmem:[#allocation4 + $0x220] sm:$0xff] }
 0x12d   : > { %1195 = vmatpush1.msra.mxu0 %v1132_v62  ;;  %v1311_v62 = vld [vmem:[#allocation4 + $0x218] sm:$0xff] }
 0x1c0   : > { %v2162_v63 = vpop.f32.mrf.mxu1 }
 0x1c1   : > { %v2173_v0 = vpop.f32.mrf.mxu0 }
 0x1c2   : > { %v647_v1 = vpop.f32.mrf.mxu1  ;;  %v734_v5 = vadd.f32 %v2173_v0, %v2162_v63  ;;  %v1098_v63 = vld [vmem:[#allocation4] sm:$0xff]  ;;  %v1339_v0 = vld [vmem:[#allocation4 + $0x2f8] sm:$0xff] }
 0x1c3   : > { %v728_v4 = vpop.f32.mrf.mxu0  ;;  %1340 = vmatprep.subr.mxu0 %v1339_v0  ;;  %v1310_v0 = vld [vmem:[#allocation4 + $0x210] sm:$0xff] }
 0x1c4   : > { %v729_v7 = vadd.f32 %v728_v4, %v647_v1  ;;  %v1446_v1 = vld [vmem:[#allocation4 + $0x3f8] sm:$0xff] }
 0x1c9   : > { %v2184_v2 = vpop.f32.mrf.mxu1 }
 0x1ca   : > { %v826_v8 = vadd.f32 %v2184_v2, %v734_v5  ;;  %v2195_v9 = vpop.f32.mrf.mxu0 }
 0x1cb   : > { %v816_v6 = vpop.f32.mrf.mxu1 }
 0x1cc   : > { %v825_v10 = vadd.f32 %v816_v6, %v729_v7  ;;  %v916_v11 = vadd.f32 %v2195_v9, %v826_v8  ;;  %v906_v12 = vpop.f32.mrf.mxu0  ;;  %v1338_v6 = vld [vmem:[#allocation4 + $0x2f0] sm:$0xff]  ;;  %v1337_v8 = vld [vmem:[#allocation4 + $0x2e8] sm:$0xff] }
 0x1cd   : > { %v1445_v7 = vld [vmem:[#allocation4 + $0x3f0] sm:$0xff] }
 0x1ce   : > { %v915_v15 = vadd.f32 %v906_v12, %v825_v10  ;;  %v1336_v12 = vld [vmem:[#allocation4 + $0x2e0] sm:$0xff] }
 0x1d2   : > { %v2206_v13 = vpop.f32.mrf.mxu1 }
 0x1d3   : > { %v1006_v16 = vadd.f32 %v2206_v13, %v916_v11  ;;  %v1444_v11 = vld [vmem:[#allocation4 + $0x3e8] sm:$0xff]  ;;  %v1443_v13 = vld [vmem:[#allocation4 + $0x3e0] sm:$0xff] }
 0x1d4   : > { %v996_v17 = vpop.f32.mrf.mxu1 }
 0x1d5   : > { %v1015_v18 = vadd.f32 %v2054_v14, %v1006_v16  ;;  %v1005_v19 = vadd.f32 %v996_v17, %v915_v15  ;;  %v1442_v15 = vld [vmem:[#allocation4 + $0x3d8] sm:$0xff]  ;;  %v1334_v16 = vld [vmem:[#allocation4 + $0x2d0] sm:$0xff] }
 0x1d6   : > { %v1441_v17 = vld [vmem:[#allocation4 + $0x3d0] sm:$0xff] }
 0x1d7   : > { %v1014_v20 = vadd.f32 %v2054_v14, %v1005_v19  ;;  %2208 = vmatpush3.msra.mxu1 %v1015_v18  ;;  %v1335_v14 = vld [vmem:[#allocation4 + $0x2d8] sm:$0xff]  ;;  %v1333_v18 = vld [vmem:[#allocation4 + $0x2c8] sm:$0xff] }
 0x1d8   : > { %2209 = vmatprep.subr.mxu1 %v2383_v3  ;;  %v1440_v19 = vld [vmem:[#allocation4 + $0x3c8] sm:$0xff] }
 0x1d9   : > { %2210 = vmatpush3.msra.mxu1 %v1014_v20  ;;  %v1332_v20 = vld [vmem:[#allocation4 + $0x2c0] sm:$0xff] }
 0x1da   : > { %2212 = vmatmul.mubr.msk.f32.vlgmr.msra.gmra.mxu1 %vm1017_vm7, %v1016_v21  ;;  %1235 = vmatprep.subr.mxu1 %v1129_v22  ;;  %v1439_v21 = vld [vmem:[#allocation4 + $0x3c0] sm:$0xff]  ;;  %v1331_v22 = vld [vmem:[#allocation4 + $0x2b8] sm:$0xff] }
 0x1db   : > { %1236 = vmatpush1.msra.mxu1 %v1128_v23  ;;  %1299 = vmatprep.mubr.f32.mxu1 %v2383_v3  ;;  %v1438_v23 = vld [vmem:[#allocation4 + $0x3b8] sm:$0xff] }
 0x1dc   : > { %1237 = vmatprep.subr.mxu1 %v1127_v24  ;;  %v1330_v24 = vld [vmem:[#allocation4 + $0x2b0] sm:$0xff] }
 0x1dd   : > { %1238 = vmatpush1.msra.mxu1 %v1126_v25  ;;  %v1437_v25 = vld [vmem:[#allocation4 + $0x3b0] sm:$0xff] }
 0x1de   : > { %1239 = vmatprep.subr.mxu1 %v1125_v26  ;;  %v1329_v26 = vld [vmem:[#allocation4 + $0x2a8] sm:$0xff] }
 0x1df   : > { %1240 = vmatpush1.msra.mxu1 %v1124_v27  ;;  %v1436_v27 = vld [vmem:[#allocation4 + $0x3a8] sm:$0xff] }
 0x1e0   : > { %1241 = vmatprep.subr.mxu1 %v1123_v28  ;;  %v1328_v28 = vld [vmem:[#allocation4 + $0x2a0] sm:$0xff] }
 0x1e1   : > { %1242 = vmatpush1.msra.mxu1 %v1122_v29  ;;  %v1435_v29 = vld [vmem:[#allocation4 + $0x3a0] sm:$0xff] }
 0x1e2   : > { %1243 = vmatprep.subr.mxu1 %v1121_v30  ;;  %v1327_v30 = vld [vmem:[#allocation4 + $0x298] sm:$0xff] }
 0x1e3   : > { %1244 = vmatpush1.msra.mxu1 %v1120_v31  ;;  %v1434_v31 = vld [vmem:[#allocation4 + $0x398] sm:$0xff] }
 0x1e4   : > { %1245 = vmatprep.subr.mxu1 %v1119_v32  ;;  %v1326_v32 = vld [vmem:[#allocation4 + $0x290] sm:$0xff] }
 0x1e5   : > { %1246 = vmatpush1.msra.mxu1 %v1118_v33  ;;  %v1433_v33 = vld [vmem:[#allocation4 + $0x390] sm:$0xff] }
 0x1e6   : > { %1247 = vmatprep.subr.mxu1 %v1117_v34  ;;  %v1325_v34 = vld [vmem:[#allocation4 + $0x288] sm:$0xff] }
 0x1e7   : > { %1248 = vmatpush1.msra.mxu1 %v1116_v35  ;;  %v1432_v35 = vld [vmem:[#allocation4 + $0x388] sm:$0xff] }
 0x1e8   : > { %1249 = vmatprep.subr.mxu1 %v1115_v36  ;;  %v1324_v36 = vld [vmem:[#allocation4 + $0x280] sm:$0xff] }
 0x1e9   : > { %1250 = vmatpush1.msra.mxu1 %v1114_v37  ;;  %v1431_v37 = vld [vmem:[#allocation4 + $0x380] sm:$0xff] }
 0x1ea   : > { %1251 = vmatprep.subr.mxu1 %v1113_v38  ;;  %v1323_v38 = vld [vmem:[#allocation4 + $0x278] sm:$0xff] }
 0x1eb   : > { %1252 = vmatpush1.msra.mxu1 %v1112_v39  ;;  %v1430_v39 = vld [vmem:[#allocation4 + $0x378] sm:$0xff] }
 0x1ec   : > { %1253 = vmatprep.subr.mxu1 %v1111_v40  ;;  %v1322_v40 = vld [vmem:[#allocation4 + $0x270] sm:$0xff] }
 0x1ed   : > { %1254 = vmatpush1.msra.mxu1 %v1110_v41  ;;  %v1429_v41 = vld [vmem:[#allocation4 + $0x370] sm:$0xff] }
 0x1ee   : > { %1255 = vmatprep.subr.mxu1 %v1109_v42  ;;  %v1321_v42 = vld [vmem:[#allocation4 + $0x268] sm:$0xff] }
 0x1ef   : > { %1256 = vmatpush1.msra.mxu1 %v1108_v43  ;;  %v1428_v43 = vld [vmem:[#allocation4 + $0x368] sm:$0xff] }
 0x1f0   : > { %1257 = vmatprep.subr.mxu1 %v1107_v45  ;;  %v1427_v45 = vld [vmem:[#allocation4 + $0x360] sm:$0xff] }
 0x1f1   : > { %1258 = vmatpush1.msra.mxu1 %v1106_v47  ;;  %v1426_v47 = vld [vmem:[#allocation4 + $0x358] sm:$0xff] }
 0x1f2   : > { %1259 = vmatprep.subr.mxu1 %v1105_v49  ;;  %v1425_v49 = vld [vmem:[#allocation4 + $0x350] sm:$0xff] }
 0x1f3   : > { %1260 = vmatpush1.msra.mxu1 %v1104_v51  ;;  %v1424_v51 = vld [vmem:[#allocation4 + $0x348] sm:$0xff] }
 0x1f4   : > { %1261 = vmatprep.subr.mxu1 %v1103_v53  ;;  %v1423_v53 = vld [vmem:[#allocation4 + $0x340] sm:$0xff] }
 0x1f5   : > { %1262 = vmatpush1.msra.mxu1 %v1102_v55  ;;  %v1422_v55 = vld [vmem:[#allocation4 + $0x338] sm:$0xff] }
 0x1f6   : > { %1263 = vmatprep.subr.mxu1 %v1101_v57  ;;  %v1421_v57 = vld [vmem:[#allocation4 + $0x330] sm:$0xff] }
 0x1f7   : > { %1264 = vmatpush1.msra.mxu1 %v1100_v59  ;;  %v1420_v59 = vld [vmem:[#allocation4 + $0x328] sm:$0xff] }
 0x1f8   : > { %1265 = vmatprep.subr.mxu1 %v1099_v61  ;;  %v1419_v61 = vld [vmem:[#allocation4 + $0x320] sm:$0xff] }
 0x1f9   : > { %1266 = vmatpush1.msra.mxu1 %v1098_v63  ;;  %v1418_v63 = vld [vmem:[#allocation4 + $0x318] sm:$0xff] }
 0x1fa   : > { %1447 = vmatprep.subr.mxu1 %v1446_v1  ;;  %v1417_v1 = vld [vmem:[#allocation4 + $0x310] sm:$0xff] }
 0x29a   : > { %v2629_v2 = vpop.f32.mrf.mxu1 }
 0x29b   : > { %vm1091_vm8 = vcmp.gt.f32.partialorder %v2629_v2, 1.0  ;;  %v1544_v2 = vld [vmem:[#allocation4 + $0x4b0] sm:$0xff] }
 0x29c   : > { %v2056_v4 = vsel %vm1091_vm8, 1.0, %v2383_v3  ;;  %v2213_v5 = vpop.f32.mrf.mxu1 }
 0x29d   : > { %1096 = vst [vmem:[#allocation3 + $0x2] sm:$0xff] %v2056_v4  ;;  %v1309_v4 = vld [vmem:[#allocation4 + $0x208] sm:$0xff] }
 0x29e   : > { %v1416_v5 = vld [vmem:[#allocation4 + $0x308] sm:$0xff] }
 0x2a4   : > { %v1130_v9 = vld [vmem:[#allocation3 + $0x1] sm:$0xff] }
 0x2a5   : > { %v1097_v10 = vld [vmem:[#allocation3] sm:$0xff]  ;;  %1229 = vmatmul.mubr.f32.vlgmr.msra.gmra.mxu0 %v1130_v9 }
 0x2a6   : > { %1300 = vmatmul.mubr.f32.vlgmr.msra.gmra.mxu1 %v1097_v10  ;;  %1341 = vmatpush1.msra.mxu0 %v1338_v6  ;;  %v1308_v6 = vld [vmem:[#allocation4 + $0x200] sm:$0xff]  ;;  %v1413_v9 = vld [vmem:[#allocation3 + $0x3] sm:$0xff] }
 0x2a7   : > { %1448 = vmatpush1.msra.mxu1 %v1445_v7  ;;  %1342 = vmatprep.subr.mxu0 %v1337_v8  ;;  %v1415_v7 = vld [vmem:[#allocation4 + $0x300] sm:$0xff]  ;;  %v1553_v8 = vld [vmem:[#allocation4 + $0x4f8] sm:$0xff]  ;;  %v1552_v10 = vld [vmem:[#allocation4 + $0x4f0] sm:$0xff] }
 0x2a8   : > { %1449 = vmatprep.subr.mxu1 %v1444_v11  ;;  %1343 = vmatpush1.msra.mxu0 %v1336_v12  ;;  %v2385_v11 = vmov 1.0   ;;  %v1551_v12 = vld [vmem:[#allocation4 + $0x4e8] sm:$0xff] }
 0x2a9   : > { %1450 = vmatpush1.msra.mxu1 %v1443_v13  ;;  %1344 = vmatprep.subr.mxu0 %v1335_v14  ;;  %v1550_v13 = vld [vmem:[#allocation4 + $0x4e0] sm:$0xff]  ;;  %v1549_v14 = vld [vmem:[#allocation4 + $0x4d8] sm:$0xff] }
 0x2aa   : > { %1451 = vmatprep.subr.mxu1 %v1442_v15  ;;  %1345 = vmatpush1.msra.mxu0 %v1334_v16  ;;  %v1548_v15 = vld [vmem:[#allocation4 + $0x4d0] sm:$0xff]  ;;  %v1547_v16 = vld [vmem:[#allocation4 + $0x4c8] sm:$0xff] }
 0x2ab   : > { %1452 = vmatpush1.msra.mxu1 %v1441_v17  ;;  %1346 = vmatprep.subr.mxu0 %v1333_v18  ;;  %v1546_v17 = vld [vmem:[#allocation4 + $0x4c0] sm:$0xff]  ;;  %v1545_v18 = vld [vmem:[#allocation4 + $0x4b8] sm:$0xff] }
 0x2ac   : > { %1453 = vmatprep.subr.mxu1 %v1440_v19  ;;  %1347 = vmatpush1.msra.mxu0 %v1332_v20  ;;  %v1543_v19 = vld [vmem:[#allocation4 + $0x4a8] sm:$0xff]  ;;  %v1542_v20 = vld [vmem:[#allocation4 + $0x4a0] sm:$0xff] }
 0x2ad   : > { %1454 = vmatpush1.msra.mxu1 %v1439_v21  ;;  %1348 = vmatprep.subr.mxu0 %v1331_v22  ;;  %v1541_v21 = vld [vmem:[#allocation4 + $0x498] sm:$0xff]  ;;  %v1540_v22 = vld [vmem:[#allocation4 + $0x490] sm:$0xff] }
 0x2ae   : > { %1455 = vmatprep.subr.mxu1 %v1438_v23  ;;  %1349 = vmatpush1.msra.mxu0 %v1330_v24  ;;  %v1539_v23 = vld [vmem:[#allocation4 + $0x488] sm:$0xff]  ;;  %v1538_v24 = vld [vmem:[#allocation4 + $0x480] sm:$0xff] }
 0x2af   : > { %1456 = vmatpush1.msra.mxu1 %v1437_v25  ;;  %1350 = vmatprep.subr.mxu0 %v1329_v26  ;;  %v1537_v25 = vld [vmem:[#allocation4 + $0x478] sm:$0xff]  ;;  %v1536_v26 = vld [vmem:[#allocation4 + $0x470] sm:$0xff] }
 0x2b0   : > { %1457 = vmatprep.subr.mxu1 %v1436_v27  ;;  %1351 = vmatpush1.msra.mxu0 %v1328_v28  ;;  %v1535_v27 = vld [vmem:[#allocation4 + $0x468] sm:$0xff]  ;;  %v1534_v28 = vld [vmem:[#allocation4 + $0x460] sm:$0xff] }
 0x2b1   : > { %1458 = vmatpush1.msra.mxu1 %v1435_v29  ;;  %1352 = vmatprep.subr.mxu0 %v1327_v30  ;;  %v1533_v29 = vld [vmem:[#allocation4 + $0x458] sm:$0xff]  ;;  %v1532_v30 = vld [vmem:[#allocation4 + $0x450] sm:$0xff] }
 0x2b2   : > { %1459 = vmatprep.subr.mxu1 %v1434_v31  ;;  %1353 = vmatpush1.msra.mxu0 %v1326_v32  ;;  %v1531_v31 = vld [vmem:[#allocation4 + $0x448] sm:$0xff]  ;;  %v1530_v32 = vld [vmem:[#allocation4 + $0x440] sm:$0xff] }
 0x2b3   : > { %1460 = vmatpush1.msra.mxu1 %v1433_v33  ;;  %1354 = vmatprep.subr.mxu0 %v1325_v34  ;;  %v1529_v33 = vld [vmem:[#allocation4 + $0x438] sm:$0xff]  ;;  %v1528_v34 = vld [vmem:[#allocation4 + $0x430] sm:$0xff] }
 0x2b4   : > { %1461 = vmatprep.subr.mxu1 %v1432_v35  ;;  %1355 = vmatpush1.msra.mxu0 %v1324_v36  ;;  %v1527_v35 = vld [vmem:[#allocation4 + $0x428] sm:$0xff]  ;;  %v1526_v36 = vld [vmem:[#allocation4 + $0x420] sm:$0xff] }
 0x2b5   : > { %1462 = vmatpush1.msra.mxu1 %v1431_v37  ;;  %1356 = vmatprep.subr.mxu0 %v1323_v38  ;;  %v1525_v37 = vld [vmem:[#allocation4 + $0x418] sm:$0xff]  ;;  %v1524_v38 = vld [vmem:[#allocation4 + $0x410] sm:$0xff] }
 0x2b6   : > { %1463 = vmatprep.subr.mxu1 %v1430_v39  ;;  %1357 = vmatpush1.msra.mxu0 %v1322_v40  ;;  %v1523_v39 = vld [vmem:[#allocation4 + $0x408] sm:$0xff]  ;;  %v1522_v40 = vld [vmem:[#allocation4 + $0x400] sm:$0xff] }
 0x2b7   : > { %1464 = vmatpush1.msra.mxu1 %v1429_v41  ;;  %1358 = vmatprep.subr.mxu0 %v1321_v42  ;;  %v1520_v41 = vld [vmem:[#allocation3 + $0x4] sm:$0xff] }
 0x2b8   : > { %1465 = vmatprep.subr.mxu1 %v1428_v43  ;;  %1359 = vmatpush1.msra.mxu0 %v1320_v44 }
 0x2b9   : > { %1466 = vmatpush1.msra.mxu1 %v1427_v45  ;;  %1360 = vmatprep.subr.mxu0 %v1319_v46  ;;  %v1629_v46 = vlaneseq }
 0x2ba   : > { %1467 = vmatprep.subr.mxu1 %v1426_v47  ;;  %1361 = vmatpush1.msra.mxu0 %v1318_v48 }
 0x2bb   : > { %1468 = vmatpush1.msra.mxu1 %v1425_v49  ;;  %1362 = vmatprep.subr.mxu0 %v1317_v50  ;;  %v1630_v50 = vshrl.u32 %v1629_v46, 7 }
 0x2bc   : > { %1469 = vmatprep.subr.mxu1 %v1424_v51  ;;  %1363 = vmatpush1.msra.mxu0 %v1316_v52 }
 0x2bd   : > { %1470 = vmatpush1.msra.mxu1 %v1423_v53  ;;  %1364 = vmatprep.subr.mxu0 %v1315_v54 }
 0x2be   : > { %1471 = vmatprep.subr.mxu1 %v1422_v55  ;;  %1365 = vmatpush1.msra.mxu0 %v1314_v56  ;;  %v1635_v55 = vsub.s32 1, %v1630_v50  ;;  %v1631_v56 = vsub.s32 0, %v1630_v50 }
 0x2bf   : > { %1472 = vmatpush1.msra.mxu1 %v1421_v57  ;;  %1366 = vmatprep.subr.mxu0 %v1313_v58  ;;  %v1627_v57 = vld [vmem:[%s2837_s8] sm:$0x3] }
 0x2c0   : > { %1473 = vmatprep.subr.mxu1 %v1420_v59  ;;  %1367 = vmatpush1.msra.mxu0 %v1312_v60 }
 0x2c1   : > { %1474 = vmatpush1.msra.mxu1 %v1419_v61  ;;  %1368 = vmatprep.subr.mxu0 %v1311_v62  ;;  %v1636_v62 = vrot.slane %v1627_v57, %v1635_v55 }
 0x2c2   : > { %1475 = vmatprep.subr.mxu1 %v1418_v63  ;;  %1369 = vmatpush1.msra.mxu0 %v1310_v0  ;;  %v1632_v0 = vrot.slane %v1627_v57, %v1631_v56 }
 0x2c3   : > { %1476 = vmatpush1.msra.mxu1 %v1417_v1  ;;  %1370 = vmatprep.subr.mxu0 %v1309_v4 }
 0x2c4   : > { %1477 = vmatprep.subr.mxu1 %v1416_v5  ;;  %1371 = vmatpush1.msra.mxu0 %v1308_v6 }
 0x2c5   : > { %1404 = vmatprep.mubr.f32.mxu0 %v2383_v3  ;;  %1478 = vmatpush1.msra.mxu1 %v1415_v7  ;;  %v1641_v7 = vld [vmem:[%s2835_s6] sm:$0xf] }
 0x2c6   : > { %1511 = vmatprep.mubr.f32.mxu1 %v2383_v3  ;;  %2287 = vmatmul.mubr.msk.f32.vlgmr.msra.gmra.mxu0 %vm1091_vm8, %v2385_v11  ;;  %v1754_v11 = vld [vmem:[%s2838_s9 + $0x70] sm:$0xff] }
 0x2c7   : > { %1512 = vmatmul.mubr.f32.vlgmr.msra.gmra.mxu1 %v1413_v9  ;;  %1554 = vmatprep.subr.mxu0 %v1553_v8  ;;  %v1771_v8 = vld [vmem:[%s2838_s9 + $0xf8] sm:$0xff] }
 0x2c8   : > { %1618 = vmatprep.mubr.f32.mxu0 %v2383_v3  ;;  %1555 = vmatpush1.msra.mxu0 %v1552_v10  ;;  %v1755_v9 = vld [vmem:[%s2838_s9 + $0x78] sm:$0xff]  ;;  %v1770_v10 = vld [vmem:[%s2838_s9 + $0xf0] sm:$0xff] }
 0x2c9   : > { %1710 = vmatprep.mubr.f32.mxu1 %v2383_v3  ;;  %1556 = vmatprep.subr.mxu0 %v1551_v12  ;;  %v1769_v12 = vld [vmem:[%s2838_s9 + $0xe8] sm:$0xff] }
 0x2ca   : > { %1557 = vmatpush1.msra.mxu0 %v1550_v13  ;;  %v1753_v13 = vld [vmem:[%s2838_s9 + $0x68] sm:$0xff] }
 0x2cb   : > { %1558 = vmatprep.subr.mxu0 %v1549_v14  ;;  %v1768_v14 = vld [vmem:[%s2838_s9 + $0xe0] sm:$0xff] }
 0x2cc   : > { %1559 = vmatpush1.msra.mxu0 %v1548_v15  ;;  %v1752_v15 = vld [vmem:[%s2838_s9 + $0x60] sm:$0xff] }
 0x2cd   : > { %1560 = vmatprep.subr.mxu0 %v1547_v16  ;;  %v1767_v16 = vld [vmem:[%s2838_s9 + $0xd8] sm:$0xff] }
 0x2ce   : > { %1561 = vmatpush1.msra.mxu0 %v1546_v17  ;;  %v1751_v17 = vld [vmem:[%s2838_s9 + $0x58] sm:$0xff] }
 0x2cf   : > { %1562 = vmatprep.subr.mxu0 %v1545_v18  ;;  %v1766_v18 = vld [vmem:[%s2838_s9 + $0xd0] sm:$0xff] }
 0x2d0   : > { %1563 = vmatpush1.msra.mxu0 %v1544_v2  ;;  %v1750_v2 = vld [vmem:[%s2838_s9 + $0x50] sm:$0xff] }
 0x2d1   : > { %1564 = vmatprep.subr.mxu0 %v1543_v19  ;;  %v1765_v19 = vld [vmem:[%s2838_s9 + $0xc8] sm:$0xff] }
 0x2d2   : > { %1565 = vmatpush1.msra.mxu0 %v1542_v20  ;;  %v1749_v20 = vld [vmem:[%s2838_s9 + $0x48] sm:$0xff] }
 0x2d3   : > { %1566 = vmatprep.subr.mxu0 %v1541_v21  ;;  %v1764_v21 = vld [vmem:[%s2838_s9 + $0xc0] sm:$0xff] }
 0x2d4   : > { %1567 = vmatpush1.msra.mxu0 %v1540_v22  ;;  %v1748_v22 = vld [vmem:[%s2838_s9 + $0x40] sm:$0xff] }
 0x2d5   : > { %1568 = vmatprep.subr.mxu0 %v1539_v23  ;;  %v1763_v23 = vld [vmem:[%s2838_s9 + $0xb8] sm:$0xff] }
 0x2d6   : > { %1569 = vmatpush1.msra.mxu0 %v1538_v24  ;;  %v1747_v24 = vld [vmem:[%s2838_s9 + $0x38] sm:$0xff] }
 0x2d7   : > { %1570 = vmatprep.subr.mxu0 %v1537_v25  ;;  %v1762_v25 = vld [vmem:[%s2838_s9 + $0xb0] sm:$0xff] }
 0x2d8   : > { %1571 = vmatpush1.msra.mxu0 %v1536_v26  ;;  %v1746_v26 = vld [vmem:[%s2838_s9 + $0x30] sm:$0xff] }
 0x2d9   : > { %1572 = vmatprep.subr.mxu0 %v1535_v27  ;;  %v1761_v27 = vld [vmem:[%s2838_s9 + $0xa8] sm:$0xff] }
 0x2da   : > { %1573 = vmatpush1.msra.mxu0 %v1534_v28  ;;  %v1745_v28 = vld [vmem:[%s2838_s9 + $0x28] sm:$0xff] }
 0x2db   : > { %1574 = vmatprep.subr.mxu0 %v1533_v29  ;;  %v1760_v29 = vld [vmem:[%s2838_s9 + $0xa0] sm:$0xff] }
 0x2dc   : > { %1575 = vmatpush1.msra.mxu0 %v1532_v30  ;;  %v1744_v30 = vld [vmem:[%s2838_s9 + $0x20] sm:$0xff] }
 0x2dd   : > { %1576 = vmatprep.subr.mxu0 %v1531_v31  ;;  %v1759_v31 = vld [vmem:[%s2838_s9 + $0x98] sm:$0xff] }
 0x2de   : > { %1577 = vmatpush1.msra.mxu0 %v1530_v32  ;;  %v1743_v32 = vld [vmem:[%s2838_s9 + $0x18] sm:$0xff] }
 0x2df   : > { %1578 = vmatprep.subr.mxu0 %v1529_v33  ;;  %v1758_v33 = vld [vmem:[%s2838_s9 + $0x90] sm:$0xff] }
 0x2e0   : > { %1579 = vmatpush1.msra.mxu0 %v1528_v34  ;;  %v1742_v34 = vld [vmem:[%s2838_s9 + $0x10] sm:$0xff] }
 0x2e1   : > { %1580 = vmatprep.subr.mxu0 %v1527_v35  ;;  %v1757_v35 = vld [vmem:[%s2838_s9 + $0x88] sm:$0xff] }
 0x2e2   : > { %1581 = vmatpush1.msra.mxu0 %v1526_v36  ;;  %v1741_v36 = vld [vmem:[%s2838_s9 + $0x8] sm:$0xff] }
 0x2e3   : > { %1582 = vmatprep.subr.mxu0 %v1525_v37  ;;  %v1756_v37 = vld [vmem:[%s2838_s9 + $0x80] sm:$0xff] }
 0x2e4   : > { %1583 = vmatpush1.msra.mxu0 %v1524_v38  ;;  %v1740_v38 = vld [vmem:[%s2838_s9] sm:$0xff] }
 0x2e5   : > { %1584 = vmatprep.subr.mxu0 %v1523_v39  ;;  %v1853_v39 = vld [vmem:[%s2840_s11 + $0x38] sm:$0xff] }
 0x2e6   : > { %1585 = vmatpush1.msra.mxu0 %v1522_v40  ;;  %v1852_v40 = vld [vmem:[%s2840_s11 + $0x30] sm:$0xff] }
 0x2e7   : > { %1619 = vmatmul.mubr.f32.vlgmr.msra.gmra.mxu0 %v1520_v41  ;;  %2214 = vmatprep.subr.mxu0 %v2383_v3  ;;  %v1851_v41 = vld [vmem:[%s2840_s11 + $0x28] sm:$0xff] }
 0x2e8   : > { %2230 = vmatprep.mubr.msk.f32.mxu0 %vm2384_vm6, %v2383_v3  ;;  %2215 = vmatpush3.msra.mxu0 %v1853_v39 }
 0x2e9   : > { %2216 = vmatprep.subr.mxu0 %v2383_v3 }
 0x2ea   : > { %2217 = vmatpush3.msra.mxu0 %v1852_v40 }
 0x2eb   : > { %2218 = vmatprep.subr.mxu0 %v2383_v3 }
 0x2ec   : > { %2219 = vmatpush3.msra.mxu0 %v1851_v41 }
 0x2ed   : > { %2220 = vmatprep.subr.mxu0 %v2383_v3 }
 0x365   : > { %v1230_v42 = vpop.f32.mrf.mxu0 }
 0x366   : > { %v1301_v43 = vpop.f32.mrf.mxu1 }
 0x367   : > { %v1232_v44 = vpop.f32.mrf.mxu0  ;;  %v1302_v48 = vadd.f32 %v1301_v43, %v1230_v42 }
 0x368   : > { %v1303_v47 = vpop.f32.mrf.mxu1 }
 0x369   : > { %v1304_v51 = vadd.f32 %v1303_v47, %v1232_v44 }
 0x386   : > { %v1406_v45 = vpop.f32.mrf.mxu0 }
 0x387   : > { %v1411_v52 = vadd.f32 %v1406_v45, %v1302_v48  ;;  %v1513_v53 = vpop.f32.mrf.mxu1 }
 0x388   : > { %v1408_v49 = vpop.f32.mrf.mxu0 }
 0x389   : > { %v1412_v54 = vadd.f32 %v1408_v49, %v1304_v51  ;;  %v1518_v58 = vadd.f32 %v1513_v53, %v1411_v52  ;;  %v1515_v59 = vpop.f32.mrf.mxu1 }
 0x38b   : > { %v1519_v61 = vadd.f32 %v1515_v59, %v1412_v54 }
 0x3a7   : > { %v1620_v60 = vpop.f32.mrf.mxu0 }
 0x3a8   : > { %v1625_v63 = vadd.f32 %v1620_v60, %v1518_v58 }
 0x3a9   : > { %v1622_v1 = vpop.f32.mrf.mxu0 }
 0x3aa   : > { %v1626_v4 = vadd.f32 %v1622_v1, %v1519_v61  ;;  %v1639_v6 = vadd.f32 %v1632_v0, %v1625_v63  ;;  %v1849_v63 = vld [vmem:[%s2840_s11 + $0x18] sm:$0xff]  ;;  %v1848_v0 = vld [vmem:[%s2840_s11 + $0x10] sm:$0xff]  ;;  %v1847_v1 = vld [vmem:[%s2840_s11 + $0x8] sm:$0xff] }
 0x3ac   : > { %v1640_v5 = vadd.f32 %v1636_v62, %v1626_v4  ;;  %v1850_v62 = vld [vmem:[%s2840_s11 + $0x20] sm:$0xff] }
 0x3ad   : > { %2221 = vmatpush3.msra.mxu0 %v1850_v62  ;;  %v1846_v4 = vld [vmem:[%s2840_s11] sm:$0xff] }
 0x3ae   : > { %1676 = vmatprep.subr.mxu1 %v1640_v5  ;;  %2222 = vmatprep.subr.mxu0 %v2383_v3 }
 0x3af   : > { %1677 = vmatpush1.msra.mxu1 %v1639_v6  ;;  %2223 = vmatpush3.msra.mxu0 %v1849_v63  ;;  %v1772_v6 = vld [vmem:[%s2839_s10] sm:$0x1] }
 0x3b0   : > { %2057 = vmatmul.mubr.msk.f32.vlgmr.msra.gmra.mxu1 %vm1642_vm9, %v1641_v7  ;;  %2103 = vmatprep.subr.mxu1 %v1771_v8 }
 0x3b1   : > { %2104 = vmatpush3.msra.mxu1 %v1755_v9  ;;  %2224 = vmatprep.subr.mxu0 %v2383_v3 }
 0x3b2   : > { %2105 = vmatprep.subr.mxu1 %v1770_v10  ;;  %2225 = vmatpush3.msra.mxu0 %v1848_v0 }
 0x3b3   : > { %2106 = vmatpush3.msra.mxu1 %v1754_v11  ;;  %2226 = vmatprep.subr.mxu0 %v2383_v3  ;;  %v1854_v11 = vld [vmem:[%s2841_s12] sm:$0x1] }
 0x3b4   : > { %2107 = vmatprep.subr.mxu1 %v1769_v12  ;;  %2227 = vmatpush3.msra.mxu0 %v1847_v1 }
 0x3b5   : > { %2108 = vmatpush3.msra.mxu1 %v1753_v13  ;;  %2228 = vmatprep.subr.mxu0 %v2383_v3 }
 0x3b6   : > { %2109 = vmatprep.subr.mxu1 %v1768_v14  ;;  %2229 = vmatpush3.msra.mxu0 %v1846_v4 }
 0x3b7   : > { %2110 = vmatpush3.msra.mxu1 %v1752_v15 }
 0x3b8   : > { %2111 = vmatprep.subr.mxu1 %v1767_v16 }
 0x3b9   : > { %2112 = vmatpush3.msra.mxu1 %v1751_v17 }
 0x3ba   : > { %2113 = vmatprep.subr.mxu1 %v1766_v18 }
 0x3bb   : > { %2114 = vmatpush3.msra.mxu1 %v1750_v2 }
 0x3bc   : > { %2115 = vmatprep.subr.mxu1 %v1765_v19 }
 0x3bd   : > { %2116 = vmatpush3.msra.mxu1 %v1749_v20 }
 0x3be   : > { %2117 = vmatprep.subr.mxu1 %v1764_v21 }
 0x3bf   : > { %2118 = vmatpush3.msra.mxu1 %v1748_v22 }
 0x3c0   : > { %2119 = vmatprep.subr.mxu1 %v1763_v23 }
 0x3c1   : > { %2120 = vmatpush3.msra.mxu1 %v1747_v24 }
 0x3c2   : > { %2121 = vmatprep.subr.mxu1 %v1762_v25 }
 0x3c3   : > { %2122 = vmatpush3.msra.mxu1 %v1746_v26 }
 0x3c4   : > { %2123 = vmatprep.subr.mxu1 %v1761_v27 }
 0x3c5   : > { %2124 = vmatpush3.msra.mxu1 %v1745_v28 }
 0x3c6   : > { %2125 = vmatprep.subr.mxu1 %v1760_v29 }
 0x3c7   : > { %2126 = vmatpush3.msra.mxu1 %v1744_v30 }
 0x3c8   : > { %2127 = vmatprep.subr.mxu1 %v1759_v31 }
 0x3c9   : > { %2128 = vmatpush3.msra.mxu1 %v1743_v32 }
 0x3ca   : > { %2129 = vmatprep.subr.mxu1 %v1758_v33 }
 0x3cb   : > { %2130 = vmatpush3.msra.mxu1 %v1742_v34 }
 0x3cc   : > { %2131 = vmatprep.subr.mxu1 %v1757_v35 }
 0x3cd   : > { %2132 = vmatpush3.msra.mxu1 %v1741_v36 }
 0x3ce   : > { %2133 = vmatprep.subr.mxu1 %v1756_v37 }
 0x3cf   : > { %2134 = vmatpush3.msra.mxu1 %v1740_v38 }
 0x470   : > { %v1712_v42 = vpop.f32.mrf.mxu1 }
 0x471   : > { %vm1717_vm10 = vcmp.gt.f32.partialorder %v1712_v42, 1.0 }
 0x472   : > { %v2058_v43 = vsel %vm1717_vm10, 1.0, %v2383_v3  ;;  %v1714_v44 = vpop.f32.mrf.mxu1 }
 0x473   : > { %v1723_v45 = vsel %vm470_vm0, %v2058_v43, 0.0  ;;  %vm1718_vm11 = vcmp.gt.f32.partialorder %v1714_v44, 1.0 }
 0x474   : > { %v1724_v46 = vrot.slane %v1723_v45, 4  ;;  %v2059_v47 = vsel %vm1718_vm11, 1.0, %v2383_v3 }
 0x475   : > { %v1730_v48 = vsel %vm470_vm0, %v2059_v47, 0.0 }
 0x476   : > { %v1725_v49 = vadd.f32 %v1724_v46, %v1723_v45  ;;  %v1731_v50 = vrot.slane %v1730_v48, 4 }
 0x478   : > { %v1726_v51 = vrot.slane %v1725_v49, 2  ;;  %v1732_v52 = vadd.f32 %v1731_v50, %v1730_v48 }
 0x47a   : > { %v1727_v53 = vadd.f32 %v1726_v51, %v1725_v49  ;;  %v1733_v54 = vrot.slane %v1732_v52, 2 }
 0x47c   : > { %v1728_v55 = vrot.slane %v1727_v53, 1  ;;  %v1734_v56 = vadd.f32 %v1733_v54, %v1732_v52 }
 0x47e   : > { %v1735_v57 = vrot.slane %v1734_v56, 1  ;;  %v1729_v58 = vadd.f32 %v1728_v55, %v1727_v53 }
 0x480   : > { %v1736_v59 = vadd.f32 %v1735_v57, %v1734_v56  ;;  %v1738_v61 = vmul.f32 0.25, %v1729_v58 }
 0x482   : > { %v1739_v60 = vmul.f32 0.25, %v1736_v59 }
 0x484   : > { %1837 = vmatprep.mubr.f32.mxu1 %v1739_v60 }
 0x485   : > { %1838 = vmatmul.mubr.f32.vlgmr.msra.gmra.mxu1 %v1738_v61 }
 0x545   : > { %v2135_v5 = vpop.f32.mrf.mxu1 }
 0x547   : > { %v2136_v7 = vpop.f32.mrf.mxu1 }
 0x548   : > { %v2137_v8 = vadd.f32 %v2136_v7, %v2135_v5 }
 0x54a   : > { %v1840_v9 = vadd.f32 %v2137_v8, %v1772_v6 }
 0x54c   : > { %vm1843_vm13 = vcmp.gt.f32.partialorder %v1840_v9, 1.0 }
 0x54d   : > { %v2060_v10 = vsel %vm1843_vm13, 1.0, %v2383_v3 }
 0x54e   : > { %2231 = vmatmul.mubr.msk.f32.vlgmr.msra.gmra.mxu0 %vm1855_vm12, %v2060_v10 }
 0x60e   : > { %v1925_v12 = vpop.f32.mrf.mxu0 }
 0x60f   : > { %v1926_v13 = vadd.f32 %v1925_v12, %v1854_v11 }
 0x610   : > { %v2232_v14 = vpop.f32.mrf.mxu0 }
 0x611   : > { %vm1929_vm15 = vcmp.gt.f32.partialorder %v1926_v13, 1.0 }
 0x612   : > { %v2062_v15 = vsel %vm1929_vm15, 1.0, %v2383_v3 }
 0x613   : > { %1933 = vst.msk [vmem:[%s447_s23] sm:$0x1] %vm1932_vm14, %v2062_v15 }
 0x614   : > { %2327 = shalt.err (!%p2324_p0)
}
 0x615   : > { %s2328_s21 = scalar_lea.hbm %s2793_s27, 16  ;;  %s2332_s22 = scalar_lea.hbm %s2842_s13, 32 }
 0x616   : > { %p2329_p1 = scmp.ne.s32.totalorder %s2793_s27, %s2328_s21  ;;  %p2333_p4 = scmp.lt.s32.totalorder %s2793_s27, %s2842_s13 }
 0x617   : > { %p2334_p7 = scmp.lt.s32.totalorder %s2332_s22, %s2328_s21 }
 0x618   : > { %p2330_p2 = pnand %p2329_p1, %p2495_p5 }
 0x619   : > { %p2335_p8 = por %p2334_p7, %p2333_p4 }
 0x61a   : > { %p2331_p3 = pneg %p2330_p2 }
 0x61c   : > { %p2336_p6 = pnand %p2335_p8, %p2331_p3 }
 0x61e   : > { %2339 = shalt.err (!%p2336_p6)
}
 0x61f   : > { %2237 = dma.vmem_to_hbm [thread:$0]  (%p2495_p5), %s1948_s15, 16, %s2793_s27, %s1935_s17  }
 0x620 PF: > { %p2249_p9 = scmp.ge.s32.totalorder %s2378_s28, 2  ;;  %s1959_s0 = sand.u32 1, %s2366_s25  }
 0x621   : > { %p2851_p10 = scmp.ne.s32.totalorder %s2848_s19, 0  ;;  %s1960_s30 = scalar_lea.sflag [#allocation6], %s1959_s0 }
 0x623   : > { %p2244_p11 = pnand %p2249_p9, %p2851_p10 }
 0x625   : > { %p2245_p12 = pneg %p2244_p11 }
 0x627   : > { %2361 = dma.done.wait (%p2245_p12), %s1960_s30, 16  }
 0x628   : > { %2363 = vsyncadd (%p2245_p12), %s1960_s30, 4294967280  ;;  %s2852_s16 = sld [smem:[#allocation10_spill]]  ;;  %p24_p13 = scmp.ge.s32.totalorder %s2482_s14, 4  }
 0x629   : > { %s2853_s27 = sld [smem:[#allocation11_spill]]  ;;  %s2854_s25 = smov %s2370_s26 }
 0x62a   : > { %s2856_s28 = smov %s2482_s14  ;;  %26 = sbr.rel (!%p24_p13) target bundleno = 6 (0x6), region = 120 }
 0x62e   : > { %s2855_s26 = smov %s2852_s16 }
 0x62f   :  { %1964 = vsyncpa [#allocation5], 1 }
 0x630   :  { %1966 = vsyncpa [#allocation5 + $0x1], 1 }
 0x631   :  { %1967 = vsyncpa [#allocation6], 1 }
 0x632   :  { %1969 = vsyncpa [#allocation6 + $0x1], 1 }

</bundles_post_ra>
